<compile_context>
chip_gen: v7x
topology: tpu7x:2x2x1
jax: 0.10.0
libtpu: 0.0.40
codegen_flags: <defaults>
</compile_context>

<pallas_src>
import functools

import jax
import jax.numpy as jnp
from jax.experimental import pallas as pl
from jax.experimental.pallas import tpu as pltpu  # noqa: F401  (TPU backend)


# ----------------------------------------------------------------------------
# Pallas kernels
# ----------------------------------------------------------------------------
def _enc_bneck_kernel(p_ref, we_ref, be_ref, wb_ref, bb_ref, enc_ref, bot_ref):
    """Encoder conv (framed matmul) + bottleneck 1x1, fused.

    p_ref : (K, B*T_enc) bf16 framed signal patches
    we_ref: (F, K) bf16, be_ref: (F, 1) f32
    wb_ref: (C, F) bf16, bb_ref: (C, 1) f32
    enc_ref: (F, B*T_enc) f32, bot_ref: (C, B*T_enc) f32
    """
    enc = jnp.dot(we_ref[...], p_ref[...],
                  preferred_element_type=jnp.float32) + be_ref[...]
    enc_ref[...] = enc
    bot = jnp.dot(wb_ref[...], enc.astype(jnp.bfloat16),
                  preferred_element_type=jnp.float32) + bb_ref[...]
    bot_ref[...] = bot


def _tcn_kernel(x_ref, cw_ref, cb_ref, g_ref, bt_ref, a_ref, pw_ref, pb_ref,
                o_ref, *, dilations, batch, t_in):
    """Whole TCN fused: for every layer, dilated k=3 conv as one K=3*Cin matmul
    (in-VMEM zero padding, batch folded along lanes), BatchNorm1d with batch
    statistics, PReLU, pointwise 1x1 conv.

    x_ref : (C, B*t_in) f32
    cw_ref: (L, C, 3C) bf16   cb_ref/g_ref/bt_ref/pb_ref: (L, C, 1) f32
    a_ref : (L, 1, 1) f32     pw_ref: (L, C, C) bf16
    o_ref : (C, B*t_final) f32
    """
    C = x_ref.shape[0]
    x = x_ref[...]                                    # (C, B*t) f32
    t = t_in
    for l, d in enumerate(dilations):
        t_out = t + 2 * d                             # padding=2d, no chomp
        # per-batch zero padding (2d each side), kept entirely in VMEM
        zp = jnp.zeros((C, 2 * d), jnp.float32)
        padded = [jnp.concatenate([zp, x[:, b * t:(b + 1) * t], zp], axis=1)
                  for b in range(batch)]              # each (C, t + 4d)
        # build the (3C, B*t_out) im2col matrix: tap k = shift by k*d
        taps = [jnp.concatenate([p[:, k * d:k * d + t_out] for p in padded],
                                axis=1) for k in range(3)]
        col = jnp.concatenate(taps, axis=0).astype(jnp.bfloat16)
        y = jnp.dot(cw_ref[l], col,
                    preferred_element_type=jnp.float32) + cb_ref[l]
        # TODO(synk): BatchNorm uses training-mode batch statistics (matches
        #             module default training behaviour, not eval running stats).
        n = y.shape[1]
        mean = jnp.sum(y, axis=1, keepdims=True) / n
        dev = y - mean
        var = jnp.sum(dev * dev, axis=1, keepdims=True) / n
        y = dev * jax.lax.rsqrt(var + 1e-5) * g_ref[l] + bt_ref[l]
        y = jnp.where(y >= 0.0, y, y * a_ref[l])      # PReLU (shared alpha)
        # pointwise 1x1 conv
        x = jnp.dot(pw_ref[l], y.astype(jnp.bfloat16),
                    preferred_element_type=jnp.float32) + pb_ref[l]
        t = t_out
    o_ref[...] = x.astype(o_ref.dtype)


def _mask_decode_kernel(x_ref, enc_ref, wm_ref, bm_ref, wd_ref, seg_ref, *,
                        batch, t_tcn, t_enc, num_sources, feats):
    """Fused mask generation (all sources), ReLU, mask*enc_out, decoder matmul.

    x_ref  : (C, B*t_tcn) f32 TCN output
    enc_ref: (F, B*t_enc) f32
    wm_ref : (S*F, C) bf16, bm_ref: (S*F, 1) f32
    wd_ref : (K, F) bf16 decoder weight (transposed)
    seg_ref: (S, K, B*t_enc) f32 decoder segments (overlap-add done outside)
    """
    # TODO(synk): the reference forward has a sequence-length mismatch (the
    # un-chomped TCN output is longer than enc_out); we crop each batch segment
    # back to the encoder length to keep enc_out * mask well-defined.
    if t_tcn != t_enc:
        x = jnp.concatenate(
            [x_ref[:, b * t_tcn:b * t_tcn + t_enc] for b in range(batch)],
            axis=1)
    else:
        x = x_ref[...]
    m = jnp.dot(wm_ref[...], x.astype(jnp.bfloat16),
                preferred_element_type=jnp.float32) + bm_ref[...]
    m = jnp.maximum(m, 0.0)                           # ReLU mask, (S*F, N)
    enc = enc_ref[...]
    enc_tiled = (jnp.concatenate([enc] * num_sources, axis=0)
                 if num_sources > 1 else enc)
    masked = (m * enc_tiled).astype(jnp.bfloat16)     # (S*F, N)
    wd = wd_ref[...]
    for s in range(num_sources):
        seg_ref[s] = jnp.dot(wd, masked[s * feats:(s + 1) * feats, :],
                             preferred_element_type=jnp.float32)


# ----------------------------------------------------------------------------
# Glue (plain JAX, fused by jit): framing, overlap-add
# ----------------------------------------------------------------------------
def frame_signal(x, kernel, stride):
    """(B, time) -> (K, B*T_enc) framed patches in channel-major folded layout."""
    B, T = x.shape
    t_enc = (T - kernel) // stride + 1
    if kernel == 2 * stride and T % stride == 0:
        chunks = x.reshape(B, T // stride, stride)
        patches = jnp.concatenate([chunks[:, :-1, :], chunks[:, 1:, :]],
                                  axis=2)                      # (B, T_enc, K)
    else:
        idx = jnp.arange(t_enc)[:, None] * stride + jnp.arange(kernel)[None, :]
        patches = x[:, idx]                                    # (B, T_enc, K)
    return jnp.transpose(patches, (2, 0, 1)).reshape(kernel, B * t_enc), t_enc


def overlap_add(segs, batch, t_enc, kernel, stride, dec_bias):
    """ConvTranspose1d overlap-add. segs: (S, K, B*t_enc)."""
    # TODO(synk): assumes kernel == 2 * stride (the module default 16/8).
    S = segs.shape[0]
    segs = segs.reshape(S, kernel, batch, t_enc)
    segs = jnp.transpose(segs, (0, 2, 3, 1))                   # (S, B, T, K)
    first = segs[..., :stride]
    second = segs[..., stride:]
    frames = (jnp.pad(first, ((0, 0), (0, 0), (0, 1), (0, 0))) +
              jnp.pad(second, ((0, 0), (0, 0), (1, 0), (0, 0))))
    out = frames.reshape(S, batch, (t_enc + 1) * stride) + dec_bias[0]
    return [out[s] for s in range(S)]


# ----------------------------------------------------------------------------
# Forward pass
# ----------------------------------------------------------------------------
def conv_tasnet_forward(mixture, pp, *, enc_kernel_size, num_sources,
                        dilations):
    stride = enc_kernel_size // 2
    B = mixture.shape[0]
    F = pp["enc_w"].shape[0]
    C = pp["bneck_w"].shape[0]
    K = enc_kernel_size

    patches, t_enc = frame_signal(mixture, K, stride)
    patches = patches.astype(jnp.bfloat16)
    N = B * t_enc

    enc_out, x = pl.pallas_call(
        _enc_bneck_kernel,
        out_shape=(jax.ShapeDtypeStruct((F, N), jnp.float32),
                   jax.ShapeDtypeStruct((C, N), jnp.float32)),
    )(patches, pp["enc_w"], pp["enc_b"], pp["bneck_w"], pp["bneck_b"])

    t_final = t_enc + 2 * sum(dilations)
    tcn_out = pl.pallas_call(
        functools.partial(_tcn_kernel, dilations=dilations, batch=B,
                          t_in=t_enc),
        out_shape=jax.ShapeDtypeStruct((C, B * t_final), jnp.float32),
    )(x, pp["tcn_conv_w"], pp["tcn_conv_b"], pp["tcn_bn_g"], pp["tcn_bn_b"],
      pp["tcn_prelu_a"], pp["tcn_pw_w"], pp["tcn_pw_b"])

    segs = pl.pallas_call(
        functools.partial(_mask_decode_kernel, batch=B, t_tcn=t_final,
                          t_enc=t_enc, num_sources=num_sources, feats=F),
        out_shape=jax.ShapeDtypeStruct((num_sources, K, N), jnp.float32),
    )(tcn_out, enc_out, pp["mask_w"], pp["mask_b"], pp["dec_wT"])

    return overlap_add(segs, B, t_enc, K, stride, pp["dec_b"])


# ----------------------------------------------------------------------------
# Parameters: synthetic PyTorch-shaped init + one-time kernel-layout prep
# ----------------------------------------------------------------------------
def init_params(key, enc_kernel_size, enc_num_feats, num_blocks, num_layers,
                bottleneck_channels, num_sources):
    keys = iter(jax.random.split(key, 1024))

    def nrm(shape, scale=0.1):
        return (scale * jax.random.normal(next(keys), shape)).astype(jnp.float32)

    F, C, K = enc_num_feats, bottleneck_channels, enc_kernel_size
    raw = {
        "enc_w": nrm((F, 1, K)), "enc_b": nrm((F,)),
        "bneck_w": nrm((C, F, 1)), "bneck_b": nrm((C,)),
        "tcn": [],
        "mask_w": [nrm((F, C, 1)) for _ in range(num_sources)],
        "mask_b": [nrm((F,)) for _ in range(num_sources)],
        "dec_w": nrm((F, 1, K)), "dec_b": nrm((1,)),
    }
    for _ in range(num_blocks):
        block = []
        for _ in range(num_layers):
            block.append({
                "conv_w": nrm((C, C, 3)), "conv_b": nrm((C,)),
                "bn_g": 1.0 + nrm((C,)), "bn_b": nrm((C,)),
                "prelu_a": jnp.float32(0.25),
                "pw_w": nrm((C, C, 1)), "pw_b": nrm((C,)),
            })
        raw["tcn"].append(block)
    return raw


def prepare_params(raw, num_blocks, num_layers):
    """One-time massaging into kernel layouts (hoisted out of the forward)."""
    F, _, K = raw["enc_w"].shape
    C = raw["bneck_w"].shape[0]
    layers = [ly for blk in raw["tcn"] for ly in blk]
    dilations = tuple(2 ** i for _ in range(num_blocks)
                      for i in range(num_layers))

    def col(v):
        return v.reshape(-1, 1).astype(jnp.float32)

    pp = {
        "enc_w": raw["enc_w"].reshape(F, K).astype(jnp.bfloat16),
        "enc_b": col(raw["enc_b"]),
        "bneck_w": raw["bneck_w"].reshape(C, F).astype(jnp.bfloat16),
        "bneck_b": col(raw["bneck_b"]),
        # (Cout, Cin, 3) -> (Cout, 3*Cin) with rows ordered [tap0|tap1|tap2]
        "tcn_conv_w": jnp.stack(
            [jnp.transpose(ly["conv_w"], (0, 2, 1)).reshape(C, 3 * C)
             for ly in layers]).astype(jnp.bfloat16),
        "tcn_conv_b": jnp.stack([col(ly["conv_b"]) for ly in layers]),
        "tcn_bn_g": jnp.stack([col(ly["bn_g"]) for ly in layers]),
        "tcn_bn_b": jnp.stack([col(ly["bn_b"]) for ly in layers]),
        "tcn_prelu_a": jnp.stack(
            [jnp.reshape(ly["prelu_a"], (1, 1)).astype(jnp.float32)
             for ly in layers]),
        "tcn_pw_w": jnp.stack(
            [ly["pw_w"].reshape(C, C) for ly in layers]).astype(jnp.bfloat16),
        "tcn_pw_b": jnp.stack([col(ly["pw_b"]) for ly in layers]),
        # all sources stacked -> one (S*F, C) matmul
        "mask_w": jnp.concatenate(
            [w.reshape(F, C) for w in raw["mask_w"]],
            axis=0).astype(jnp.bfloat16),
        "mask_b": jnp.concatenate([col(b) for b in raw["mask_b"]], axis=0),
        "dec_wT": jnp.transpose(raw["dec_w"].reshape(F, K)).astype(jnp.bfloat16),
        "dec_b": raw["dec_b"].astype(jnp.float32),
    }
    return pp, dilations


# ----------------------------------------------------------------------------
if __name__ == "__main__":
    # Small shapes consistent with the module.
    batch = 2
    time = 128
    enc_kernel_size = 16
    enc_num_feats = 32
    num_blocks = 2
    num_layers = 2
    bottleneck_channels = 16
    num_sources = 2

    key = jax.random.PRNGKey(0)
    kp, kx = jax.random.split(key)
    raw = init_params(kp, enc_kernel_size, enc_num_feats, num_blocks,
                      num_layers, bottleneck_channels, num_sources)
    params, dilations = prepare_params(raw, num_blocks, num_layers)
    mixture = jax.random.normal(kx, (batch, time), dtype=jnp.float32)

    fwd = jax.jit(functools.partial(conv_tasnet_forward,
                                    enc_kernel_size=enc_kernel_size,
                                    num_sources=num_sources,
                                    dilations=dilations))
    outputs = fwd(mixture, params)
    for o in outputs:
        jax.block_until_ready(o)
    # sanity: each separated signal is (batch, (T_enc - 1) * 8 + 16) = (2, 128)
    print("KERNEL_OK")
</pallas_src>

<mosaic_0001>
module attributes {stable_mosaic.version = 11 : i64} {
  func.func @_enc_bneck_kernel(%arg0: memref<16x30xbf16, #tpu.memory_space<vmem>>, %arg1: memref<32x16xbf16, #tpu.memory_space<vmem>>, %arg2: memref<32x1xf32, #tpu.memory_space<vmem>>, %arg3: memref<16x32xbf16, #tpu.memory_space<vmem>>, %arg4: memref<16x1xf32, #tpu.memory_space<vmem>>, %arg5: memref<32x30xf32, #tpu.memory_space<vmem>>, %arg6: memref<16x30xf32, #tpu.memory_space<vmem>>) attributes {dimension_semantics = [], scalar_prefetch = 0 : i64, scratch_operands = 0 : i64, tpu.core_type = #tpu.core_type<tc>} {
    %c0 = arith.constant 0 : index
    %c0_0 = arith.constant 0 : index
    %0 = vector.load %arg1[%c0, %c0_0] : memref<32x16xbf16, #tpu.memory_space<vmem>>, vector<32x16xbf16>
    %c0_1 = arith.constant 0 : index
    %c0_2 = arith.constant 0 : index
    %1 = vector.load %arg0[%c0_1, %c0_2] : memref<16x30xbf16, #tpu.memory_space<vmem>>, vector<16x30xbf16>
    %cst = arith.constant dense<0.000000e+00> : vector<32x30xf32>
    %2 = tpu.matmul %0, %1, %cst {dimension_numbers = #tpu.dot_dimension_numbers<[1], [0], [0], [1], [0, 0, 1, 1], [], []>} : vector<32x16xbf16>, vector<16x30xbf16>, vector<32x30xf32> -> vector<32x30xf32>
    %c0_3 = arith.constant 0 : index
    %c0_4 = arith.constant 0 : index
    %3 = vector.load %arg2[%c0_3, %c0_4] : memref<32x1xf32, #tpu.memory_space<vmem>>, vector<32x1xf32>
    %4 = vector.broadcast %3 : vector<32x1xf32> to vector<32x30xf32>
    %5 = arith.addf %2, %4 : vector<32x30xf32>
    %c0_5 = arith.constant 0 : index
    %c0_6 = arith.constant 0 : index
    %6 = vector.load %arg5[%c0_5, %c0_6] : memref<32x30xf32, #tpu.memory_space<vmem>>, vector<32x30xf32>
    tpu.vector_store %arg5[%c0_5, %c0_6], %5 {strides = array<i32>} : memref<32x30xf32, #tpu.memory_space<vmem>>, vector<32x30xf32>,
    %c0_7 = arith.constant 0 : index
    %c0_8 = arith.constant 0 : index
    %7 = vector.load %arg3[%c0_7, %c0_8] : memref<16x32xbf16, #tpu.memory_space<vmem>>, vector<16x32xbf16>
    %8 = arith.truncf %5 : vector<32x30xf32> to vector<32x30xbf16>
    %cst_9 = arith.constant dense<0.000000e+00> : vector<16x30xf32>
    %9 = tpu.matmul %7, %8, %cst_9 {dimension_numbers = #tpu.dot_dimension_numbers<[1], [0], [0], [1], [0, 0, 1, 1], [], []>} : vector<16x32xbf16>, vector<32x30xbf16>, vector<16x30xf32> -> vector<16x30xf32>
    %c0_10 = arith.constant 0 : index
    %c0_11 = arith.constant 0 : index
    %10 = vector.load %arg4[%c0_10, %c0_11] : memref<16x1xf32, #tpu.memory_space<vmem>>, vector<16x1xf32>
    %11 = vector.broadcast %10 : vector<16x1xf32> to vector<16x30xf32>
    %12 = arith.addf %9, %11 : vector<16x30xf32>
    %c0_12 = arith.constant 0 : index
    %c0_13 = arith.constant 0 : index
    %13 = vector.load %arg6[%c0_12, %c0_13] : memref<16x30xf32, #tpu.memory_space<vmem>>, vector<16x30xf32>
    tpu.vector_store %arg6[%c0_12, %c0_13], %12 {strides = array<i32>} : memref<16x30xf32, #tpu.memory_space<vmem>>, vector<16x30xf32>,
    return
  }
}

module attributes {stable_mosaic.version = 11 : i64} {
  func.func @_tcn_kernel(%arg0: memref<16x30xf32, #tpu.memory_space<vmem>>, %arg1: memref<4x16x48xbf16, #tpu.memory_space<vmem>>, %arg2: memref<4x16x1xf32, #tpu.memory_space<vmem>>, %arg3: memref<4x16x1xf32, #tpu.memory_space<vmem>>, %arg4: memref<4x16x1xf32, #tpu.memory_space<vmem>>, %arg5: memref<4x1x1xf32, #tpu.memory_space<vmem>>, %arg6: memref<4x16x16xbf16, #tpu.memory_space<vmem>>, %arg7: memref<4x16x1xf32, #tpu.memory_space<vmem>>, %arg8: memref<16x54xf32, #tpu.memory_space<vmem>>) attributes {dimension_semantics = [], scalar_prefetch = 0 : i64, scratch_operands = 0 : i64, tpu.core_type = #tpu.core_type<tc>} {
    %c0 = arith.constant 0 : index
    %c0_0 = arith.constant 0 : index
    %0 = vector.load %arg0[%c0, %c0_0] : memref<16x30xf32, #tpu.memory_space<vmem>>, vector<16x30xf32>
    %cst = arith.constant 0.000000e+00 : f32
    %1 = vector.broadcast %cst : f32 to vector<16x2xf32>
    %2 = vector.extract_strided_slice %0 {offsets = [0, 0], sizes = [16, 15], strides = [1, 1]} : vector<16x30xf32> to vector<16x15xf32>
    %3 = tpu.concatenate %1, %2, %1 in 1 : vector<16x2xf32>, vector<16x15xf32>, vector<16x2xf32> -> vector<16x19xf32>
    %4 = vector.extract_strided_slice %0 {offsets = [0, 15], sizes = [16, 15], strides = [1, 1]} : vector<16x30xf32> to vector<16x15xf32>
    %5 = tpu.concatenate %1, %4, %1 in 1 : vector<16x2xf32>, vector<16x15xf32>, vector<16x2xf32> -> vector<16x19xf32>
    %6 = vector.extract_strided_slice %3 {offsets = [0, 0], sizes = [16, 17], strides = [1, 1]} : vector<16x19xf32> to vector<16x17xf32>
    %7 = vector.extract_strided_slice %5 {offsets = [0, 0], sizes = [16, 17], strides = [1, 1]} : vector<16x19xf32> to vector<16x17xf32>
    %8 = tpu.concatenate %6, %7 in 1 : vector<16x17xf32>, vector<16x17xf32> -> vector<16x34xf32>
    %9 = vector.extract_strided_slice %3 {offsets = [0, 1], sizes = [16, 17], strides = [1, 1]} : vector<16x19xf32> to vector<16x17xf32>
    %10 = vector.extract_strided_slice %5 {offsets = [0, 1], sizes = [16, 17], strides = [1, 1]} : vector<16x19xf32> to vector<16x17xf32>
    %11 = tpu.concatenate %9, %10 in 1 : vector<16x17xf32>, vector<16x17xf32> -> vector<16x34xf32>
    %12 = vector.extract_strided_slice %3 {offsets = [0, 2], sizes = [16, 17], strides = [1, 1]} : vector<16x19xf32> to vector<16x17xf32>
    %13 = vector.extract_strided_slice %5 {offsets = [0, 2], sizes = [16, 17], strides = [1, 1]} : vector<16x19xf32> to vector<16x17xf32>
    %14 = tpu.concatenate %12, %13 in 1 : vector<16x17xf32>, vector<16x17xf32> -> vector<16x34xf32>
    %15 = tpu.concatenate %8, %11, %14 in 0 : vector<16x34xf32>, vector<16x34xf32>, vector<16x34xf32> -> vector<48x34xf32>
    %16 = arith.truncf %15 : vector<48x34xf32> to vector<48x34xbf16>
    %c0_1 = arith.constant 0 : index
    %c0_2 = arith.constant 0 : index
    %c0_3 = arith.constant 0 : index
    %17 = vector.load %arg1[%c0_1, %c0_2, %c0_3] : memref<4x16x48xbf16, #tpu.memory_space<vmem>>, vector<1x16x48xbf16>
    %18 = vector.shape_cast %17 : vector<1x16x48xbf16> to vector<16x48xbf16>
    %cst_4 = arith.constant dense<0.000000e+00> : vector<16x34xf32>
    %19 = tpu.matmul %18, %16, %cst_4 {dimension_numbers = #tpu.dot_dimension_numbers<[1], [0], [0], [1], [0, 0, 1, 1], [], []>} : vector<16x48xbf16>, vector<48x34xbf16>, vector<16x34xf32> -> vector<16x34xf32>
    %c0_5 = arith.constant 0 : index
    %c0_6 = arith.constant 0 : index
    %c0_7 = arith.constant 0 : index
    %20 = vector.load %arg2[%c0_5, %c0_6, %c0_7] : memref<4x16x1xf32, #tpu.memory_space<vmem>>, vector<1x16x1xf32>
    %21 = vector.shape_cast %20 : vector<1x16x1xf32> to vector<16x1xf32>
    %22 = vector.broadcast %21 : vector<16x1xf32> to vector<16x34xf32>
    %23 = arith.addf %19, %22 : vector<16x34xf32>
    %cst_8 = arith.constant dense<0.000000e+00> : vector<16xf32>
    %24 = vector.multi_reduction <add>, %23, %cst_8 [1] : vector<16x34xf32> to vector<16xf32>
    %25 = vector.shape_cast %24 : vector<16xf32> to vector<16x1xf32>
    %cst_9 = arith.constant 3.400000e+01 : f32
    %26 = vector.broadcast %cst_9 : f32 to vector<16x1xf32>
    %27 = arith.divf %25, %26 : vector<16x1xf32>
    %28 = vector.broadcast %27 : vector<16x1xf32> to vector<16x34xf32>
    %29 = arith.subf %23, %28 : vector<16x34xf32>
    %30 = arith.mulf %29, %29 : vector<16x34xf32>
    %cst_10 = arith.constant dense<0.000000e+00> : vector<16xf32>
    %31 = vector.multi_reduction <add>, %30, %cst_10 [1] : vector<16x34xf32> to vector<16xf32>
    %32 = vector.shape_cast %31 : vector<16xf32> to vector<16x1xf32>
    %cst_11 = arith.constant 3.400000e+01 : f32
    %33 = vector.broadcast %cst_11 : f32 to vector<16x1xf32>
    %34 = arith.divf %32, %33 : vector<16x1xf32>
    %cst_12 = arith.constant 9.99999974E-6 : f32
    %35 = vector.broadcast %cst_12 : f32 to vector<16x1xf32>
    %36 = arith.addf %34, %35 : vector<16x1xf32>
    %37 = math.rsqrt %36 : vector<16x1xf32>
    %38 = vector.broadcast %37 : vector<16x1xf32> to vector<16x34xf32>
    %39 = arith.mulf %29, %38 : vector<16x34xf32>
    %c0_13 = arith.constant 0 : index
    %c0_14 = arith.constant 0 : index
    %c0_15 = arith.constant 0 : index
    %40 = vector.load %arg3[%c0_13, %c0_14, %c0_15] : memref<4x16x1xf32, #tpu.memory_space<vmem>>, vector<1x16x1xf32>
    %41 = vector.shape_cast %40 : vector<1x16x1xf32> to vector<16x1xf32>
    %42 = vector.broadcast %41 : vector<16x1xf32> to vector<16x34xf32>
    %43 = arith.mulf %39, %42 : vector<16x34xf32>
    %c0_16 = arith.constant 0 : index
    %c0_17 = arith.constant 0 : index
    %c0_18 = arith.constant 0 : index
    %44 = vector.load %arg4[%c0_16, %c0_17, %c0_18] : memref<4x16x1xf32, #tpu.memory_space<vmem>>, vector<1x16x1xf32>
    %45 = vector.shape_cast %44 : vector<1x16x1xf32> to vector<16x1xf32>
    %46 = vector.broadcast %45 : vector<16x1xf32> to vector<16x34xf32>
    %47 = arith.addf %43, %46 : vector<16x34xf32>
    %cst_19 = arith.constant 0.000000e+00 : f32
    %48 = vector.broadcast %cst_19 : f32 to vector<16x34xf32>
    %49 = arith.cmpf oge, %47, %48 : vector<16x34xf32>
    %c0_20 = arith.constant 0 : index
    %c0_21 = arith.constant 0 : index
    %c0_22 = arith.constant 0 : index
    %50 = vector.load %arg5[%c0_20, %c0_21, %c0_22] : memref<4x1x1xf32, #tpu.memory_space<vmem>>, vector<1x1x1xf32>
    %51 = vector.shape_cast %50 : vector<1x1x1xf32> to vector<1x1xf32>
    %52 = vector.broadcast %51 : vector<1x1xf32> to vector<16x34xf32>
    %53 = arith.mulf %47, %52 : vector<16x34xf32>
    %54 = arith.select %49, %47, %53 : vector<16x34xi1>, vector<16x34xf32>
    %c0_23 = arith.constant 0 : index
    %c0_24 = arith.constant 0 : index
    %c0_25 = arith.constant 0 : index
    %55 = vector.load %arg6[%c0_23, %c0_24, %c0_25] : memref<4x16x16xbf16, #tpu.memory_space<vmem>>, vector<1x16x16xbf16>
    %56 = vector.shape_cast %55 : vector<1x16x16xbf16> to vector<16x16xbf16>
    %57 = arith.truncf %54 : vector<16x34xf32> to vector<16x34xbf16>
    %cst_26 = arith.constant dense<0.000000e+00> : vector<16x34xf32>
    %58 = tpu.matmul %56, %57, %cst_26 {dimension_numbers = #tpu.dot_dimension_numbers<[1], [0], [0], [1], [0, 0, 1, 1], [], []>} : vector<16x16xbf16>, vector<16x34xbf16>, vector<16x34xf32> -> vector<16x34xf32>
    %c0_27 = arith.constant 0 : index
    %c0_28 = arith.constant 0 : index
    %c0_29 = arith.constant 0 : index
    %59 = vector.load %arg7[%c0_27, %c0_28, %c0_29] : memref<4x16x1xf32, #tpu.memory_space<vmem>>, vector<1x16x1xf32>
    %60 = vector.shape_cast %59 : vector<1x16x1xf32> to vector<16x1xf32>
    %61 = vector.broadcast %60 : vector<16x1xf32> to vector<16x34xf32>
    %62 = arith.addf %58, %61 : vector<16x34xf32>
    %cst_30 = arith.constant 0.000000e+00 : f32
    %63 = vector.broadcast %cst_30 : f32 to vector<16x4xf32>
    %64 = vector.extract_strided_slice %62 {offsets = [0, 0], sizes = [16, 17], strides = [1, 1]} : vector<16x34xf32> to vector<16x17xf32>
    %65 = tpu.concatenate %63, %64, %63 in 1 : vector<16x4xf32>, vector<16x17xf32>, vector<16x4xf32> -> vector<16x25xf32>
    %66 = vector.extract_strided_slice %62 {offsets = [0, 17], sizes = [16, 17], strides = [1, 1]} : vector<16x34xf32> to vector<16x17xf32>
    %67 = tpu.concatenate %63, %66, %63 in 1 : vector<16x4xf32>, vector<16x17xf32>, vector<16x4xf32> -> vector<16x25xf32>
    %68 = vector.extract_strided_slice %65 {offsets = [0, 0], sizes = [16, 21], strides = [1, 1]} : vector<16x25xf32> to vector<16x21xf32>
    %69 = vector.extract_strided_slice %67 {offsets = [0, 0], sizes = [16, 21], strides = [1, 1]} : vector<16x25xf32> to vector<16x21xf32>
    %70 = tpu.concatenate %68, %69 in 1 : vector<16x21xf32>, vector<16x21xf32> -> vector<16x42xf32>
    %71 = vector.extract_strided_slice %65 {offsets = [0, 2], sizes = [16, 21], strides = [1, 1]} : vector<16x25xf32> to vector<16x21xf32>
    %72 = vector.extract_strided_slice %67 {offsets = [0, 2], sizes = [16, 21], strides = [1, 1]} : vector<16x25xf32> to vector<16x21xf32>
    %73 = tpu.concatenate %71, %72 in 1 : vector<16x21xf32>, vector<16x21xf32> -> vector<16x42xf32>
    %74 = vector.extract_strided_slice %65 {offsets = [0, 4], sizes = [16, 21], strides = [1, 1]} : vector<16x25xf32> to vector<16x21xf32>
    %75 = vector.extract_strided_slice %67 {offsets = [0, 4], sizes = [16, 21], strides = [1, 1]} : vector<16x25xf32> to vector<16x21xf32>
    %76 = tpu.concatenate %74, %75 in 1 : vector<16x21xf32>, vector<16x21xf32> -> vector<16x42xf32>
    %77 = tpu.concatenate %70, %73, %76 in 0 : vector<16x42xf32>, vector<16x42xf32>, vector<16x42xf32> -> vector<48x42xf32>
    %78 = arith.truncf %77 : vector<48x42xf32> to vector<48x42xbf16>
    %c1 = arith.constant 1 : index
    %c0_31 = arith.constant 0 : index
    %c0_32 = arith.constant 0 : index
    %79 = vector.load %arg1[%c1, %c0_31, %c0_32] : memref<4x16x48xbf16, #tpu.memory_space<vmem>>, vector<1x16x48xbf16>
    %80 = vector.shape_cast %79 : vector<1x16x48xbf16> to vector<16x48xbf16>
    %cst_33 = arith.constant dense<0.000000e+00> : vector<16x42xf32>
    %81 = tpu.matmul %80, %78, %cst_33 {dimension_numbers = #tpu.dot_dimension_numbers<[1], [0], [0], [1], [0, 0, 1, 1], [], []>} : vector<16x48xbf16>, vector<48x42xbf16>, vector<16x42xf32> -> vector<16x42xf32>
    %c1_34 = arith.constant 1 : index
    %c0_35 = arith.constant 0 : index
    %c0_36 = arith.constant 0 : index
    %82 = vector.load %arg2[%c1_34, %c0_35, %c0_36] : memref<4x16x1xf32, #tpu.memory_space<vmem>>, vector<1x16x1xf32>
    %83 = vector.shape_cast %82 : vector<1x16x1xf32> to vector<16x1xf32>
    %84 = vector.broadcast %83 : vector<16x1xf32> to vector<16x42xf32>
    %85 = arith.addf %81, %84 : vector<16x42xf32>
    %cst_37 = arith.constant dense<0.000000e+00> : vector<16xf32>
    %86 = vector.multi_reduction <add>, %85, %cst_37 [1] : vector<16x42xf32> to vector<16xf32>
    %87 = vector.shape_cast %86 : vector<16xf32> to vector<16x1xf32>
    %cst_38 = arith.constant 4.200000e+01 : f32
    %88 = vector.broadcast %cst_38 : f32 to vector<16x1xf32>
    %89 = arith.divf %87, %88 : vector<16x1xf32>
    %90 = vector.broadcast %89 : vector<16x1xf32> to vector<16x42xf32>
    %91 = arith.subf %85, %90 : vector<16x42xf32>
    %92 = arith.mulf %91, %91 : vector<16x42xf32>
    %cst_39 = arith.constant dense<0.000000e+00> : vector<16xf32>
    %93 = vector.multi_reduction <add>, %92, %cst_39 [1] : vector<16x42xf32> to vector<16xf32>
    %94 = vector.shape_cast %93 : vector<16xf32> to vector<16x1xf32>
    %cst_40 = arith.constant 4.200000e+01 : f32
    %95 = vector.broadcast %cst_40 : f32 to vector<16x1xf32>
    %96 = arith.divf %94, %95 : vector<16x1xf32>
    %cst_41 = arith.constant 9.99999974E-6 : f32
    %97 = vector.broadcast %cst_41 : f32 to vector<16x1xf32>
    %98 = arith.addf %96, %97 : vector<16x1xf32>
    %99 = math.rsqrt %98 : vector<16x1xf32>
    %100 = vector.broadcast %99 : vector<16x1xf32> to vector<16x42xf32>
    %101 = arith.mulf %91, %100 : vector<16x42xf32>
    %c1_42 = arith.constant 1 : index
    %c0_43 = arith.constant 0 : index
    %c0_44 = arith.constant 0 : index
    %102 = vector.load %arg3[%c1_42, %c0_43, %c0_44] : memref<4x16x1xf32, #tpu.memory_space<vmem>>, vector<1x16x1xf32>
    %103 = vector.shape_cast %102 : vector<1x16x1xf32> to vector<16x1xf32>
    %104 = vector.broadcast %103 : vector<16x1xf32> to vector<16x42xf32>
    %105 = arith.mulf %101, %104 : vector<16x42xf32>
    %c1_45 = arith.constant 1 : index
    %c0_46 = arith.constant 0 : index
    %c0_47 = arith.constant 0 : index
    %106 = vector.load %arg4[%c1_45, %c0_46, %c0_47] : memref<4x16x1xf32, #tpu.memory_space<vmem>>, vector<1x16x1xf32>
    %107 = vector.shape_cast %106 : vector<1x16x1xf32> to vector<16x1xf32>
    %108 = vector.broadcast %107 : vector<16x1xf32> to vector<16x42xf32>
    %109 = arith.addf %105, %108 : vector<16x42xf32>
    %cst_48 = arith.constant 0.000000e+00 : f32
    %110 = vector.broadcast %cst_48 : f32 to vector<16x42xf32>
    %111 = arith.cmpf oge, %109, %110 : vector<16x42xf32>
    %c1_49 = arith.constant 1 : index
    %c0_50 = arith.constant 0 : index
    %c0_51 = arith.constant 0 : index
    %112 = vector.load %arg5[%c1_49, %c0_50, %c0_51] : memref<4x1x1xf32, #tpu.memory_space<vmem>>, vector<1x1x1xf32>
    %113 = vector.shape_cast %112 : vector<1x1x1xf32> to vector<1x1xf32>
    %114 = vector.broadcast %113 : vector<1x1xf32> to vector<16x42xf32>
    %115 = arith.mulf %109, %114 : vector<16x42xf32>
    %116 = arith.select %111, %109, %115 : vector<16x42xi1>, vector<16x42xf32>
    %c1_52 = arith.constant 1 : index
    %c0_53 = arith.constant 0 : index
    %c0_54 = arith.constant 0 : index
    %117 = vector.load %arg6[%c1_52, %c0_53, %c0_54] : memref<4x16x16xbf16, #tpu.memory_space<vmem>>, vector<1x16x16xbf16>
    %118 = vector.shape_cast %117 : vector<1x16x16xbf16> to vector<16x16xbf16>
    %119 = arith.truncf %116 : vector<16x42xf32> to vector<16x42xbf16>
    %cst_55 = arith.constant dense<0.000000e+00> : vector<16x42xf32>
    %120 = tpu.matmul %118, %119, %cst_55 {dimension_numbers = #tpu.dot_dimension_numbers<[1], [0], [0], [1], [0, 0, 1, 1], [], []>} : vector<16x16xbf16>, vector<16x42xbf16>, vector<16x42xf32> -> vector<16x42xf32>
    %c1_56 = arith.constant 1 : index
    %c0_57 = arith.constant 0 : index
    %c0_58 = arith.constant 0 : index
    %121 = vector.load %arg7[%c1_56, %c0_57, %c0_58] : memref<4x16x1xf32, #tpu.memory_space<vmem>>, vector<1x16x1xf32>
    %122 = vector.shape_cast %121 : vector<1x16x1xf32> to vector<16x1xf32>
    %123 = vector.broadcast %122 : vector<16x1xf32> to vector<16x42xf32>
    %124 = arith.addf %120, %123 : vector<16x42xf32>
    %cst_59 = arith.constant 0.000000e+00 : f32
    %125 = vector.broadcast %cst_59 : f32 to vector<16x2xf32>
    %126 = vector.extract_strided_slice %124 {offsets = [0, 0], sizes = [16, 21], strides = [1, 1]} : vector<16x42xf32> to vector<16x21xf32>
    %127 = tpu.concatenate %125, %126, %125 in 1 : vector<16x2xf32>, vector<16x21xf32>, vector<16x2xf32> -> vector<16x25xf32>
    %128 = vector.extract_strided_slice %124 {offsets = [0, 21], sizes = [16, 21], strides = [1, 1]} : vector<16x42xf32> to vector<16x21xf32>
    %129 = tpu.concatenate %125, %128, %125 in 1 : vector<16x2xf32>, vector<16x21xf32>, vector<16x2xf32> -> vector<16x25xf32>
    %130 = vector.extract_strided_slice %127 {offsets = [0, 0], sizes = [16, 23], strides = [1, 1]} : vector<16x25xf32> to vector<16x23xf32>
    %131 = vector.extract_strided_slice %129 {offsets = [0, 0], sizes = [16, 23], strides = [1, 1]} : vector<16x25xf32> to vector<16x23xf32>
    %132 = tpu.concatenate %130, %131 in 1 : vector<16x23xf32>, vector<16x23xf32> -> vector<16x46xf32>
    %133 = vector.extract_strided_slice %127 {offsets = [0, 1], sizes = [16, 23], strides = [1, 1]} : vector<16x25xf32> to vector<16x23xf32>
    %134 = vector.extract_strided_slice %129 {offsets = [0, 1], sizes = [16, 23], strides = [1, 1]} : vector<16x25xf32> to vector<16x23xf32>
    %135 = tpu.concatenate %133, %134 in 1 : vector<16x23xf32>, vector<16x23xf32> -> vector<16x46xf32>
    %136 = vector.extract_strided_slice %127 {offsets = [0, 2], sizes = [16, 23], strides = [1, 1]} : vector<16x25xf32> to vector<16x23xf32>
    %137 = vector.extract_strided_slice %129 {offsets = [0, 2], sizes = [16, 23], strides = [1, 1]} : vector<16x25xf32> to vector<16x23xf32>
    %138 = tpu.concatenate %136, %137 in 1 : vector<16x23xf32>, vector<16x23xf32> -> vector<16x46xf32>
    %139 = tpu.concatenate %132, %135, %138 in 0 : vector<16x46xf32>, vector<16x46xf32>, vector<16x46xf32> -> vector<48x46xf32>
    %140 = arith.truncf %139 : vector<48x46xf32> to vector<48x46xbf16>
    %c2 = arith.constant 2 : index
    %c0_60 = arith.constant 0 : index
    %c0_61 = arith.constant 0 : index
    %141 = vector.load %arg1[%c2, %c0_60, %c0_61] : memref<4x16x48xbf16, #tpu.memory_space<vmem>>, vector<1x16x48xbf16>
    %142 = vector.shape_cast %141 : vector<1x16x48xbf16> to vector<16x48xbf16>
    %cst_62 = arith.constant dense<0.000000e+00> : vector<16x46xf32>
    %143 = tpu.matmul %142, %140, %cst_62 {dimension_numbers = #tpu.dot_dimension_numbers<[1], [0], [0], [1], [0, 0, 1, 1], [], []>} : vector<16x48xbf16>, vector<48x46xbf16>, vector<16x46xf32> -> vector<16x46xf32>
    %c2_63 = arith.constant 2 : index
    %c0_64 = arith.constant 0 : index
    %c0_65 = arith.constant 0 : index
    %144 = vector.load %arg2[%c2_63, %c0_64, %c0_65] : memref<4x16x1xf32, #tpu.memory_space<vmem>>, vector<1x16x1xf32>
    %145 = vector.shape_cast %144 : vector<1x16x1xf32> to vector<16x1xf32>
    %146 = vector.broadcast %145 : vector<16x1xf32> to vector<16x46xf32>
    %147 = arith.addf %143, %146 : vector<16x46xf32>
    %cst_66 = arith.constant dense<0.000000e+00> : vector<16xf32>
    %148 = vector.multi_reduction <add>, %147, %cst_66 [1] : vector<16x46xf32> to vector<16xf32>
    %149 = vector.shape_cast %148 : vector<16xf32> to vector<16x1xf32>
    %cst_67 = arith.constant 4.600000e+01 : f32
    %150 = vector.broadcast %cst_67 : f32 to vector<16x1xf32>
    %151 = arith.divf %149, %150 : vector<16x1xf32>
    %152 = vector.broadcast %151 : vector<16x1xf32> to vector<16x46xf32>
    %153 = arith.subf %147, %152 : vector<16x46xf32>
    %154 = arith.mulf %153, %153 : vector<16x46xf32>
    %cst_68 = arith.constant dense<0.000000e+00> : vector<16xf32>
    %155 = vector.multi_reduction <add>, %154, %cst_68 [1] : vector<16x46xf32> to vector<16xf32>
    %156 = vector.shape_cast %155 : vector<16xf32> to vector<16x1xf32>
    %cst_69 = arith.constant 4.600000e+01 : f32
    %157 = vector.broadcast %cst_69 : f32 to vector<16x1xf32>
    %158 = arith.divf %156, %157 : vector<16x1xf32>
    %cst_70 = arith.constant 9.99999974E-6 : f32
    %159 = vector.broadcast %cst_70 : f32 to vector<16x1xf32>
    %160 = arith.addf %158, %159 : vector<16x1xf32>
    %161 = math.rsqrt %160 : vector<16x1xf32>
    %162 = vector.broadcast %161 : vector<16x1xf32> to vector<16x46xf32>
    %163 = arith.mulf %153, %162 : vector<16x46xf32>
    %c2_71 = arith.constant 2 : index
    %c0_72 = arith.constant 0 : index
    %c0_73 = arith.constant 0 : index
    %164 = vector.load %arg3[%c2_71, %c0_72, %c0_73] : memref<4x16x1xf32, #tpu.memory_space<vmem>>, vector<1x16x1xf32>
    %165 = vector.shape_cast %164 : vector<1x16x1xf32> to vector<16x1xf32>
    %166 = vector.broadcast %165 : vector<16x1xf32> to vector<16x46xf32>
    %167 = arith.mulf %163, %166 : vector<16x46xf32>
    %c2_74 = arith.constant 2 : index
    %c0_75 = arith.constant 0 : index
    %c0_76 = arith.constant 0 : index
    %168 = vector.load %arg4[%c2_74, %c0_75, %c0_76] : memref<4x16x1xf32, #tpu.memory_space<vmem>>, vector<1x16x1xf32>
    %169 = vector.shape_cast %168 : vector<1x16x1xf32> to vector<16x1xf32>
    %170 = vector.broadcast %169 : vector<16x1xf32> to vector<16x46xf32>
    %171 = arith.addf %167, %170 : vector<16x46xf32>
    %cst_77 = arith.constant 0.000000e+00 : f32
    %172 = vector.broadcast %cst_77 : f32 to vector<16x46xf32>
    %173 = arith.cmpf oge, %171, %172 : vector<16x46xf32>
    %c2_78 = arith.constant 2 : index
    %c0_79 = arith.constant 0 : index
    %c0_80 = arith.constant 0 : index
    %174 = vector.load %arg5[%c2_78, %c0_79, %c0_80] : memref<4x1x1xf32, #tpu.memory_space<vmem>>, vector<1x1x1xf32>
    %175 = vector.shape_cast %174 : vector<1x1x1xf32> to vector<1x1xf32>
    %176 = vector.broadcast %175 : vector<1x1xf32> to vector<16x46xf32>
    %177 = arith.mulf %171, %176 : vector<16x46xf32>
    %178 = arith.select %173, %171, %177 : vector<16x46xi1>, vector<16x46xf32>
    %c2_81 = arith.constant 2 : index
    %c0_82 = arith.constant 0 : index
    %c0_83 = arith.constant 0 : index
    %179 = vector.load %arg6[%c2_81, %c0_82, %c0_83] : memref<4x16x16xbf16, #tpu.memory_space<vmem>>, vector<1x16x16xbf16>
    %180 = vector.shape_cast %179 : vector<1x16x16xbf16> to vector<16x16xbf16>
    %181 = arith.truncf %178 : vector<16x46xf32> to vector<16x46xbf16>
    %cst_84 = arith.constant dense<0.000000e+00> : vector<16x46xf32>
    %182 = tpu.matmul %180, %181, %cst_84 {dimension_numbers = #tpu.dot_dimension_numbers<[1], [0], [0], [1], [0, 0, 1, 1], [], []>} : vector<16x16xbf16>, vector<16x46xbf16>, vector<16x46xf32> -> vector<16x46xf32>
    %c2_85 = arith.constant 2 : index
    %c0_86 = arith.constant 0 : index
    %c0_87 = arith.constant 0 : index
    %183 = vector.load %arg7[%c2_85, %c0_86, %c0_87] : memref<4x16x1xf32, #tpu.memory_space<vmem>>, vector<1x16x1xf32>
    %184 = vector.shape_cast %183 : vector<1x16x1xf32> to vector<16x1xf32>
    %185 = vector.broadcast %184 : vector<16x1xf32> to vector<16x46xf32>
    %186 = arith.addf %182, %185 : vector<16x46xf32>
    %cst_88 = arith.constant 0.000000e+00 : f32
    %187 = vector.broadcast %cst_88 : f32 to vector<16x4xf32>
    %188 = vector.extract_strided_slice %186 {offsets = [0, 0], sizes = [16, 23], strides = [1, 1]} : vector<16x46xf32> to vector<16x23xf32>
    %189 = tpu.concatenate %187, %188, %187 in 1 : vector<16x4xf32>, vector<16x23xf32>, vector<16x4xf32> -> vector<16x31xf32>
    %190 = vector.extract_strided_slice %186 {offsets = [0, 23], sizes = [16, 23], strides = [1, 1]} : vector<16x46xf32> to vector<16x23xf32>
    %191 = tpu.concatenate %187, %190, %187 in 1 : vector<16x4xf32>, vector<16x23xf32>, vector<16x4xf32> -> vector<16x31xf32>
    %192 = vector.extract_strided_slice %189 {offsets = [0, 0], sizes = [16, 27], strides = [1, 1]} : vector<16x31xf32> to vector<16x27xf32>
    %193 = vector.extract_strided_slice %191 {offsets = [0, 0], sizes = [16, 27], strides = [1, 1]} : vector<16x31xf32> to vector<16x27xf32>
    %194 = tpu.concatenate %192, %193 in 1 : vector<16x27xf32>, vector<16x27xf32> -> vector<16x54xf32>
    %195 = vector.extract_strided_slice %189 {offsets = [0, 2], sizes = [16, 27], strides = [1, 1]} : vector<16x31xf32> to vector<16x27xf32>
    %196 = vector.extract_strided_slice %191 {offsets = [0, 2], sizes = [16, 27], strides = [1, 1]} : vector<16x31xf32> to vector<16x27xf32>
    %197 = tpu.concatenate %195, %196 in 1 : vector<16x27xf32>, vector<16x27xf32> -> vector<16x54xf32>
    %198 = vector.extract_strided_slice %189 {offsets = [0, 4], sizes = [16, 27], strides = [1, 1]} : vector<16x31xf32> to vector<16x27xf32>
    %199 = vector.extract_strided_slice %191 {offsets = [0, 4], sizes = [16, 27], strides = [1, 1]} : vector<16x31xf32> to vector<16x27xf32>
    %200 = tpu.concatenate %198, %199 in 1 : vector<16x27xf32>, vector<16x27xf32> -> vector<16x54xf32>
    %201 = tpu.concatenate %194, %197, %200 in 0 : vector<16x54xf32>, vector<16x54xf32>, vector<16x54xf32> -> vector<48x54xf32>
    %202 = arith.truncf %201 : vector<48x54xf32> to vector<48x54xbf16>
    %c3 = arith.constant 3 : index
    %c0_89 = arith.constant 0 : index
    %c0_90 = arith.constant 0 : index
    %203 = vector.load %arg1[%c3, %c0_89, %c0_90] : memref<4x16x48xbf16, #tpu.memory_space<vmem>>, vector<1x16x48xbf16>
    %204 = vector.shape_cast %203 : vector<1x16x48xbf16> to vector<16x48xbf16>
    %cst_91 = arith.constant dense<0.000000e+00> : vector<16x54xf32>
    %205 = tpu.matmul %204, %202, %cst_91 {dimension_numbers = #tpu.dot_dimension_numbers<[1], [0], [0], [1], [0, 0, 1, 1], [], []>} : vector<16x48xbf16>, vector<48x54xbf16>, vector<16x54xf32> -> vector<16x54xf32>
    %c3_92 = arith.constant 3 : index
    %c0_93 = arith.constant 0 : index
    %c0_94 = arith.constant 0 : index
    %206 = vector.load %arg2[%c3_92, %c0_93, %c0_94] : memref<4x16x1xf32, #tpu.memory_space<vmem>>, vector<1x16x1xf32>
    %207 = vector.shape_cast %206 : vector<1x16x1xf32> to vector<16x1xf32>
    %208 = vector.broadcast %207 : vector<16x1xf32> to vector<16x54xf32>
    %209 = arith.addf %205, %208 : vector<16x54xf32>
    %cst_95 = arith.constant dense<0.000000e+00> : vector<16xf32>
    %210 = vector.multi_reduction <add>, %209, %cst_95 [1] : vector<16x54xf32> to vector<16xf32>
    %211 = vector.shape_cast %210 : vector<16xf32> to vector<16x1xf32>
    %cst_96 = arith.constant 5.400000e+01 : f32
    %212 = vector.broadcast %cst_96 : f32 to vector<16x1xf32>
    %213 = arith.divf %211, %212 : vector<16x1xf32>
    %214 = vector.broadcast %213 : vector<16x1xf32> to vector<16x54xf32>
    %215 = arith.subf %209, %214 : vector<16x54xf32>
    %216 = arith.mulf %215, %215 : vector<16x54xf32>
    %cst_97 = arith.constant dense<0.000000e+00> : vector<16xf32>
    %217 = vector.multi_reduction <add>, %216, %cst_97 [1] : vector<16x54xf32> to vector<16xf32>
    %218 = vector.shape_cast %217 : vector<16xf32> to vector<16x1xf32>
    %cst_98 = arith.constant 5.400000e+01 : f32
    %219 = vector.broadcast %cst_98 : f32 to vector<16x1xf32>
    %220 = arith.divf %218, %219 : vector<16x1xf32>
    %cst_99 = arith.constant 9.99999974E-6 : f32
    %221 = vector.broadcast %cst_99 : f32 to vector<16x1xf32>
    %222 = arith.addf %220, %221 : vector<16x1xf32>
    %223 = math.rsqrt %222 : vector<16x1xf32>
    %224 = vector.broadcast %223 : vector<16x1xf32> to vector<16x54xf32>
    %225 = arith.mulf %215, %224 : vector<16x54xf32>
    %c3_100 = arith.constant 3 : index
    %c0_101 = arith.constant 0 : index
    %c0_102 = arith.constant 0 : index
    %226 = vector.load %arg3[%c3_100, %c0_101, %c0_102] : memref<4x16x1xf32, #tpu.memory_space<vmem>>, vector<1x16x1xf32>
    %227 = vector.shape_cast %226 : vector<1x16x1xf32> to vector<16x1xf32>
    %228 = vector.broadcast %227 : vector<16x1xf32> to vector<16x54xf32>
    %229 = arith.mulf %225, %228 : vector<16x54xf32>
    %c3_103 = arith.constant 3 : index
    %c0_104 = arith.constant 0 : index
    %c0_105 = arith.constant 0 : index
    %230 = vector.load %arg4[%c3_103, %c0_104, %c0_105] : memref<4x16x1xf32, #tpu.memory_space<vmem>>, vector<1x16x1xf32>
    %231 = vector.shape_cast %230 : vector<1x16x1xf32> to vector<16x1xf32>
    %232 = vector.broadcast %231 : vector<16x1xf32> to vector<16x54xf32>
    %233 = arith.addf %229, %232 : vector<16x54xf32>
    %cst_106 = arith.constant 0.000000e+00 : f32
    %234 = vector.broadcast %cst_106 : f32 to vector<16x54xf32>
    %235 = arith.cmpf oge, %233, %234 : vector<16x54xf32>
    %c3_107 = arith.constant 3 : index
    %c0_108 = arith.constant 0 : index
    %c0_109 = arith.constant 0 : index
    %236 = vector.load %arg5[%c3_107, %c0_108, %c0_109] : memref<4x1x1xf32, #tpu.memory_space<vmem>>, vector<1x1x1xf32>
    %237 = vector.shape_cast %236 : vector<1x1x1xf32> to vector<1x1xf32>
    %238 = vector.broadcast %237 : vector<1x1xf32> to vector<16x54xf32>
    %239 = arith.mulf %233, %238 : vector<16x54xf32>
    %240 = arith.select %235, %233, %239 : vector<16x54xi1>, vector<16x54xf32>
    %c3_110 = arith.constant 3 : index
    %c0_111 = arith.constant 0 : index
    %c0_112 = arith.constant 0 : index
    %241 = vector.load %arg6[%c3_110, %c0_111, %c0_112] : memref<4x16x16xbf16, #tpu.memory_space<vmem>>, vector<1x16x16xbf16>
    %242 = vector.shape_cast %241 : vector<1x16x16xbf16> to vector<16x16xbf16>
    %243 = arith.truncf %240 : vector<16x54xf32> to vector<16x54xbf16>
    %cst_113 = arith.constant dense<0.000000e+00> : vector<16x54xf32>
    %244 = tpu.matmul %242, %243, %cst_113 {dimension_numbers = #tpu.dot_dimension_numbers<[1], [0], [0], [1], [0, 0, 1, 1], [], []>} : vector<16x16xbf16>, vector<16x54xbf16>, vector<16x54xf32> -> vector<16x54xf32>
    %c3_114 = arith.constant 3 : index
    %c0_115 = arith.constant 0 : index
    %c0_116 = arith.constant 0 : index
    %245 = vector.load %arg7[%c3_114, %c0_115, %c0_116] : memref<4x16x1xf32, #tpu.memory_space<vmem>>, vector<1x16x1xf32>
    %246 = vector.shape_cast %245 : vector<1x16x1xf32> to vector<16x1xf32>
    %247 = vector.broadcast %246 : vector<16x1xf32> to vector<16x54xf32>
    %248 = arith.addf %244, %247 : vector<16x54xf32>
    %c0_117 = arith.constant 0 : index
    %c0_118 = arith.constant 0 : index
    %249 = vector.load %arg8[%c0_117, %c0_118] : memref<16x54xf32, #tpu.memory_space<vmem>>, vector<16x54xf32>
    tpu.vector_store %arg8[%c0_117, %c0_118], %248 {strides = array<i32>} : memref<16x54xf32, #tpu.memory_space<vmem>>, vector<16x54xf32>,
    return
  }
}

module attributes {stable_mosaic.version = 11 : i64} {
  func.func @_mask_decode_kernel(%arg0: memref<16x54xf32, #tpu.memory_space<vmem>>, %arg1: memref<32x30xf32, #tpu.memory_space<vmem>>, %arg2: memref<64x16xbf16, #tpu.memory_space<vmem>>, %arg3: memref<64x1xf32, #tpu.memory_space<vmem>>, %arg4: memref<16x32xbf16, #tpu.memory_space<vmem>>, %arg5: memref<2x16x30xf32, #tpu.memory_space<vmem>>) attributes {dimension_semantics = [], scalar_prefetch = 0 : i64, scratch_operands = 0 : i64, tpu.core_type = #tpu.core_type<tc>} {
    %c0 = arith.constant 0 : index
    %c0_0 = arith.constant 0 : index
    %0 = vector.load %arg0[%c0, %c0_0] : memref<16x54xf32, #tpu.memory_space<vmem>>, vector<16x15xf32>
    %c0_1 = arith.constant 0 : index
    %c27 = arith.constant 27 : index
    %1 = vector.load %arg0[%c0_1, %c27] : memref<16x54xf32, #tpu.memory_space<vmem>>, vector<16x15xf32>
    %2 = tpu.concatenate %0, %1 in 1 : vector<16x15xf32>, vector<16x15xf32> -> vector<16x30xf32>
    %c0_2 = arith.constant 0 : index
    %c0_3 = arith.constant 0 : index
    %3 = vector.load %arg2[%c0_2, %c0_3] : memref<64x16xbf16, #tpu.memory_space<vmem>>, vector<64x16xbf16>
    %4 = arith.truncf %2 : vector<16x30xf32> to vector<16x30xbf16>
    %cst = arith.constant dense<0.000000e+00> : vector<64x30xf32>
    %5 = tpu.matmul %3, %4, %cst {dimension_numbers = #tpu.dot_dimension_numbers<[1], [0], [0], [1], [0, 0, 1, 1], [], []>} : vector<64x16xbf16>, vector<16x30xbf16>, vector<64x30xf32> -> vector<64x30xf32>
    %c0_4 = arith.constant 0 : index
    %c0_5 = arith.constant 0 : index
    %6 = vector.load %arg3[%c0_4, %c0_5] : memref<64x1xf32, #tpu.memory_space<vmem>>, vector<64x1xf32>
    %7 = vector.broadcast %6 : vector<64x1xf32> to vector<64x30xf32>
    %8 = arith.addf %5, %7 : vector<64x30xf32>
    %cst_6 = arith.constant 0.000000e+00 : f32
    %9 = vector.broadcast %cst_6 : f32 to vector<64x30xf32>
    %10 = arith.maximumf %8, %9 : vector<64x30xf32>
    %c0_7 = arith.constant 0 : index
    %c0_8 = arith.constant 0 : index
    %11 = vector.load %arg1[%c0_7, %c0_8] : memref<32x30xf32, #tpu.memory_space<vmem>>, vector<32x30xf32>
    %12 = tpu.concatenate %11, %11 in 0 : vector<32x30xf32>, vector<32x30xf32> -> vector<64x30xf32>
    %13 = arith.mulf %10, %12 : vector<64x30xf32>
    %14 = arith.truncf %13 : vector<64x30xf32> to vector<64x30xbf16>
    %c0_9 = arith.constant 0 : index
    %c0_10 = arith.constant 0 : index
    %15 = vector.load %arg4[%c0_9, %c0_10] : memref<16x32xbf16, #tpu.memory_space<vmem>>, vector<16x32xbf16>
    %16 = vector.extract_strided_slice %14 {offsets = [0, 0], sizes = [32, 30], strides = [1, 1]} : vector<64x30xbf16> to vector<32x30xbf16>
    %cst_11 = arith.constant dense<0.000000e+00> : vector<16x30xf32>
    %17 = tpu.matmul %15, %16, %cst_11 {dimension_numbers = #tpu.dot_dimension_numbers<[1], [0], [0], [1], [0, 0, 1, 1], [], []>} : vector<16x32xbf16>, vector<32x30xbf16>, vector<16x30xf32> -> vector<16x30xf32>
    %c0_12 = arith.constant 0 : index
    %c0_13 = arith.constant 0 : index
    %c0_14 = arith.constant 0 : index
    %18 = vector.load %arg5[%c0_12, %c0_13, %c0_14] : memref<2x16x30xf32, #tpu.memory_space<vmem>>, vector<1x16x30xf32>
    %19 = vector.shape_cast %18 : vector<1x16x30xf32> to vector<16x30xf32>
    %20 = vector.shape_cast %17 : vector<16x30xf32> to vector<1x16x30xf32>
    tpu.vector_store %arg5[%c0_12, %c0_13, %c0_14], %20 {strides = array<i32>} : memref<2x16x30xf32, #tpu.memory_space<vmem>>, vector<1x16x30xf32>,
    %21 = vector.extract_strided_slice %14 {offsets = [32, 0], sizes = [32, 30], strides = [1, 1]} : vector<64x30xbf16> to vector<32x30xbf16>
    %cst_15 = arith.constant dense<0.000000e+00> : vector<16x30xf32>
    %22 = tpu.matmul %15, %21, %cst_15 {dimension_numbers = #tpu.dot_dimension_numbers<[1], [0], [0], [1], [0, 0, 1, 1], [], []>} : vector<16x32xbf16>, vector<32x30xbf16>, vector<16x30xf32> -> vector<16x30xf32>
    %c1 = arith.constant 1 : index
    %c0_16 = arith.constant 0 : index
    %c0_17 = arith.constant 0 : index
    %23 = vector.load %arg5[%c1, %c0_16, %c0_17] : memref<2x16x30xf32, #tpu.memory_space<vmem>>, vector<1x16x30xf32>
    %24 = vector.shape_cast %23 : vector<1x16x30xf32> to vector<16x30xf32>
    %25 = vector.shape_cast %22 : vector<16x30xf32> to vector<1x16x30xf32>
    tpu.vector_store %arg5[%c1, %c0_16, %c0_17], %25 {strides = array<i32>} : memref<2x16x30xf32, #tpu.memory_space<vmem>>, vector<1x16x30xf32>,
    return
  }
}

</mosaic_0001>

<bundles_post_ra>
// kernel: squeeze.4
= control target key start
LH: loop header
LB: loop body
LE: loop exit
PB: predicated region body
PF: predicated region fallthrough
CT: control target
= control target key end

     0   :  { %s8_s6 = smov 3  ;;  %s22_s9 = smov 3  ;;  %s269_s0 = inlined_call_operand.vmem [shape: f32[1,2,16,8], index: 0, kind: input, shape index: {}]   ;;  %s270_s1 = inlined_call_operand.hbm [shape: f32[2,128], index: 1, kind: output, shape index: {}]  }
   0x1   :  { %v128_v0 = vld [vmem:[%s269_s0 + $0xf] ss:$16 sm:%s8_s6]   ;;  %s183_s10 = smov 120   ;;  %v130_v1 = vld [vmem:[%s269_s0 + $0xd] ss:$16 sm:%s22_s9]   ;;  %s15_s13 = smov 3 }
   0x2   :  { %10 = vrot.lane.b32.xlu0 %v128_v0, %s183_s10  ;;  %s184_s14 = smov 104   ;;  %v129_v2 = vld [vmem:[%s269_s0 + $0xe] ss:$16 sm:%s15_s13]   ;;  %s29_s17 = smov 3 }
   0x3   :  { %24 = vrot.lane.b32.xlu1 %v130_v1, %s184_s14  ;;  %v131_v3 = vld [vmem:[%s269_s0 + $0xc] ss:$16 sm:%s29_s17]   ;;  %s36_s20 = smov 3 }
   0x4   :  { %2 = vsyncpa [#allocation1], 0  ;;  %s43_s21 = smov 3  ;;  %s185_s22 = smov 112   ;;  %v132_v4 = vld [vmem:[%s269_s0 + $0xb] ss:$16 sm:%s36_s20]  }
   0x5   :  { %s186_s23 = smov 96   ;;  %v133_v5 = vld [vmem:[%s269_s0 + $0xa] ss:$16 sm:%s43_s21]   ;;  %s50_s28 = smov 3  ;;  %vm5_vm0 = vcmask 64512   ;;  %vm12_vm1 = vcmask 1048512  }
   0x6   :  { %17 = vrot.lane.b32.xlu0 %v129_v2, %s185_s22  ;;  %s57_s29 = smov 3  ;;  %s187_s30 = smov 88   ;;  %v134_v6 = vld [vmem:[%s269_s0 + $0x9] ss:$16 sm:%s50_s28]   ;;  %vm19_vm2 = vcmask 982912   ;;  %vm26_vm3 = vcmask 917312  }
   0x7   :  { %31 = vrot.lane.b32.xlu1 %v131_v3, %s186_s23  ;;  %s188_s2 = smov 80   ;;  %v135_v7 = vld [vmem:[%s269_s0 + $0x8] ss:$16 sm:%s57_s29]   ;;  %s64_s7 = smov 3  ;;  %vm33_vm4 = vcmask 851712   ;;  %vm40_vm5 = vcmask 786112  }
   0x8   :  { %s71_s8 = smov 3  ;;  %s189_s9 = smov 72   ;;  %v136_v8 = vld [vmem:[%s269_s0 + $0x7] ss:$16 sm:%s64_s7]   ;;  %vm47_vm6 = vcmask 720512   ;;  %vm54_vm7 = vcmask 654912  }
   0x9   :  { %s190_s10 = smov 64   ;;  %s3_s13 = smov 3  ;;  %v137_v9 = vld [vmem:[%s269_s0 + $0x6] ss:$16 sm:%s71_s8]   ;;  %vm61_vm8 = vcmask 589312   ;;  %vm68_vm9 = vcmask 523712  }
   0xa   :  { %38 = vrot.lane.b32.xlu0 %v132_v4, %s187_s30  ;;  %s78_s16 = smov 3  ;;  %v4_v10 = vld [vmem:[%s269_s0] ss:$16 sm:%s3_s13]   ;;  %s85_s19 = smov 3  ;;  %vm75_vm10 = vcmask 458112   ;;  %vm82_vm11 = vcmask 392512  }
   0xb   :  { %45 = vrot.lane.b32.xlu1 %v133_v5, %s188_s2  ;;  %6 = vst.msk [vmem:[#allocation2] sm:$0x3] %vm5_vm0, %v4_v10   ;;  %s191_s20 = smov 56   ;;  %s192_s21 = smov 48   ;;  %v138_v11 = vld [vmem:[%s269_s0 + $0x5] ss:$16 sm:%s78_s16]  }
   0xc   :  { %v139_v12 = vld [vmem:[%s269_s0 + $0x4] ss:$16 sm:%s85_s19]   ;;  %s92_s26 = smov 3  ;;  %s99_s27 = smov 3  ;;  %vm89_vm12 = vcmask 326912   ;;  %vm96_vm13 = vcmask 261312  }
   0xd   :  { %s193_s28 = smov 40   ;;  %s194_s29 = smov 32   ;;  %v140_v13 = vld [vmem:[%s269_s0 + $0x3] ss:$16 sm:%s92_s26]   ;;  %v141_v14 = vld [vmem:[%s269_s0 + $0x2] ss:$16 sm:%s99_s27]  }
   0xe   :  { %52 = vrot.lane.b32.xlu0 %v134_v6, %s189_s9  ;;  %s106_s5 = smov 3  ;;  %s195_s6 = smov 24   ;;  %vm103_vm14 = vcmask 195712   ;;  %vm110_vm15 = vcmask 130112  }
   0xf   :  { %59 = vrot.lane.b32.xlu1 %v135_v7, %s190_s10  ;;  %s196_s7 = smov 16   ;;  %v142_v15 = vld [vmem:[%s269_s0 + $0x1] ss:$16 sm:%s106_s5]   ;;  %s197_s0 = smov 8  }
  0x10   :  { %s198_s10 = smov [#allocation0]  }
  0x11   :  { %s122_s11 = sshll.u32 %s198_s10, 4  ;;  %s123_s11 = int_to_ptr.vmem [resolvable:$true] %s122_s11 }
  0x12   :  { %66 = vrot.lane.b32.xlu0 %v136_v8, %s191_s20  ;;  %s159_s12 = scalar_lea.vmem %s123_s11, 32  ;;  %p164_p1 = scmp.lt.s32.totalorder %s123_s11, %s123_s11 }
  0x13   :  { %73 = vrot.lane.b32.xlu1 %v137_v9, %s192_s21  ;;  %p160_p0 = scmp.ne.s32.totalorder %s123_s11, %s159_s12  ;;  %p165_p2 = scmp.lt.s32.totalorder %s159_s12, %s159_s12 }
  0x15   :  { %p166_p3 = por %p165_p2, %p164_p1 }
  0x16   :  { %80 = vrot.lane.b32.xlu0 %v138_v11, %s193_s28 }
  0x17   :  { %87 = vrot.lane.b32.xlu1 %v139_v12, %s194_s29  ;;  %p167_p4 = pnand %p166_p3, %p160_p0 }
  0x1a   :  { %94 = vrot.lane.b32.xlu0 %v140_v13, %s195_s6 }
  0x1b   :  { %101 = vrot.lane.b32.xlu1 %v141_v14, %s196_s7 }
  0x1e   :  { %108 = vrot.lane.b32.xlu0 %v142_v15, %s197_s0 }
  0x74   :  { %v11_v16 = vpop.permute.xlu0 %10  }
  0x75   :  { %13 = vst.msk [vmem:[#allocation2] sm:$0x3] %vm12_vm1, %v11_v16   ;;  %v25_v17 = vpop.permute.xlu1 %24  }
  0x78   :  { %v18_v18 = vpop.permute.xlu0 %17  }
  0x79   :  { %20 = vst.msk [vmem:[#allocation2] sm:$0x3] %vm19_vm2, %v18_v18   ;;  %v32_v19 = vpop.permute.xlu1 %31  }
  0x7a   :  { %27 = vst.msk [vmem:[#allocation2] sm:$0x3] %vm26_vm3, %v25_v17  }
  0x7b   :  { %34 = vst.msk [vmem:[#allocation2] sm:$0x3] %vm33_vm4, %v32_v19  }
  0x7c   :  { %v39_v20 = vpop.permute.xlu0 %38  }
  0x7d   :  { %41 = vst.msk [vmem:[#allocation2] sm:$0x3] %vm40_vm5, %v39_v20   ;;  %v46_v21 = vpop.permute.xlu1 %45  }
  0x7e   :  { %48 = vst.msk [vmem:[#allocation2] sm:$0x3] %vm47_vm6, %v46_v21  }
  0x80   :  { %v53_v22 = vpop.permute.xlu0 %52  }
  0x81   :  { %55 = vst.msk [vmem:[#allocation2] sm:$0x3] %vm54_vm7, %v53_v22   ;;  %v60_v23 = vpop.permute.xlu1 %59  }
  0x82   :  { %62 = vst.msk [vmem:[#allocation2] sm:$0x3] %vm61_vm8, %v60_v23  }
  0x84   :  { %v67_v24 = vpop.permute.xlu0 %66  }
  0x85   :  { %69 = vst.msk [vmem:[#allocation2] sm:$0x3] %vm68_vm9, %v67_v24   ;;  %v74_v25 = vpop.permute.xlu1 %73  }
  0x86   :  { %76 = vst.msk [vmem:[#allocation2] sm:$0x3] %vm75_vm10, %v74_v25  }
  0x88   :  { %v81_v26 = vpop.permute.xlu0 %80  }
  0x89   :  { %83 = vst.msk [vmem:[#allocation2] sm:$0x3] %vm82_vm11, %v81_v26   ;;  %v88_v27 = vpop.permute.xlu1 %87  }
  0x8a   :  { %90 = vst.msk [vmem:[#allocation2] sm:$0x3] %vm89_vm12, %v88_v27  }
  0x8c   :  { %v95_v28 = vpop.permute.xlu0 %94  }
  0x8d   :  { %97 = vst.msk [vmem:[#allocation2] sm:$0x3] %vm96_vm13, %v95_v28   ;;  %v102_v29 = vpop.permute.xlu1 %101  }
  0x8e   :  { %104 = vst.msk [vmem:[#allocation2] sm:$0x3] %vm103_vm14, %v102_v29  }
  0x90   :  { %v109_v30 = vpop.permute.xlu0 %108  }
  0x91   :  { %111 = vst.msk [vmem:[#allocation2] sm:$0x3] %vm110_vm15, %v109_v30  }
  0x98   :  { %v115_v31 = vld [vmem:[#allocation2] sm:$0x3] }
  0x99   :  { %117 = vst [vmem:[#allocation0] sm:$0x3] %v115_v31 }
  0x9a   :  { %170 = shalt.err (!%p167_p4)
}
  0x9b   :  { %s171_s15 = scalar_lea.hbm %s270_s1, 32 }
  0x9c   :  { %p172_p5 = scmp.ne.s32.totalorder %s270_s1, %s171_s15  ;;  %p175_p6 = scmp.lt.u32.totalorder %s171_s15, %s270_s1 }
  0x9e   :  { %p177_p7 = pnand %p175_p6, %p172_p5 }
  0xa0   :  { %180 = shalt.err (!%p177_p7)
}
  0xa1   :  { %125 = dma.vmem_to_hbm [thread:$0]  %s123_s11, 32, %s270_s1, [#allocation1]  }
  0xa2   :  { %181 = dma.done.wait [#allocation1], 32  }
  0xa3   :  { %182 = vsyncadd [#allocation1], 4294967264 }
  0xa4   :  { %127 = vsyncpa [#allocation1], 1 }

// kernel: conv_tasnet_forward.3
= control target key start
LH: loop header
LB: loop body
LE: loop exit
PB: predicated region body
PF: predicated region fallthrough
CT: control target
= control target key end

     0   :  { %vm69_vm0 = vcmask 130048   ;;  %v242_v1 = vmov 0   ;;  %v243_v10 = vmov 0.0   ;;  %vm244_vm1 = vmmov 0   ;;  %s336_s0 = inlined_call_operand.vmem [shape: bf16[16,30], index: 0, kind: input, shape index: {}]   ;;  %s337_s1 = inlined_call_operand.vmem [shape: bf16[32,16], index: 1, kind: input, shape index: {}]   ;;  %s338_s2 = inlined_call_operand.vmem [shape: f32[32,1], index: 2, kind: input, shape index: {}]   ;;  %s339_s4 = inlined_call_operand.vmem [shape: f32[16,1], index: 4, kind: input, shape index: {}]   ;;  %s340_s3 = inlined_call_operand.vmem [shape: bf16[16,32], index: 3, kind: input, shape index: {}]   ;;  %s341_s5 = inlined_call_operand.vmem [shape: f32[32,30], index: 5, kind: output, shape index: {0}]   ;;  %s342_s6 = inlined_call_operand.vmem [shape: f32[16,30], index: 6, kind: output, shape index: {1}]  }
   0x1   :  { %v238_v0 = vld [vmem:[%s336_s0] sm:$0xff]   ;;  %236 = vset.pattern.permute.xlu0 %v242_v1  ;;  %237 = vset.pattern.permute.xlu1 %v242_v1  ;;  %v240_v3 = vld [vmem:[%s337_s1 + $0x8] sm:$0xff]   ;;  %v31_v5 = vld [vmem:[%s338_s2 + $0x10] sm:$0xff]  ;;  %vm125_vm2 = vcmask 244736   ;;  %vm151_vm3 = vcmask 261120  }
   0x2   :  { %v239_v2 = vld [vmem:[%s337_s1] sm:$0xff]   ;;  %219 = vmatprep.subr.bf16.mxu0 %v238_v0  ;;  %45 = vperm.xlu1 %237, %v31_v5   ;;  %v30_v6 = vld [vmem:[%s338_s2 + $0x8] sm:$0xff]  ;;  %v32_v7 = vld [vmem:[%s338_s2 + $0x18] sm:$0xff] }
   0x3   :  { %220 = vmatpush3.bf16.msra.mxu0 %v238_v0  ;;  %221 = vmatprep.mubr.msk.bf16.mxu0 %vm69_vm0, %v239_v2  ;;  %v29_v4 = vld [vmem:[%s338_s2] sm:$0xff]  ;;  %v135_v9 = vld [vmem:[%s339_s4 + $0x8] sm:$0xff] }
   0x4   :  { %35 = vperm.xlu0 %236, %v29_v4   ;;  %v134_v8 = vld [vmem:[%s339_s4] sm:$0xff]  ;;  %225 = vmatprep.subr.bf16.mxu1 %v243_v10 }
   0x5   :  { %229 = vmatprep.mubr.msk.bf16.mxu1 %vm244_vm1, %v243_v10  ;;  %v241_v25 = vld [vmem:[%s340_s3] sm:$0xff]  }
   0x6   :  { %222 = vmatmul.mubr.msk.bf16.vlgmr.msra.gmra.mrb[0].mxu0 %vm69_vm0, %v240_v3  ;;  %50 = vperm.xlu1 %237, %v32_v7  }
   0x8   :  { %40 = vperm.xlu0 %236, %v30_v6  }
   0xa   :  { %143 = vperm.xlu1 %237, %v135_v9  }
   0xc   :  { %138 = vperm.xlu0 %236, %v134_v8  }
  0x81   :  { %v46_v11 = vpop.permute.xlu1 %45 }
  0x83   :  { %v36_v12 = vpop.permute.xlu0 %35 }
  0x85   :  { %v51_v16 = vpop.permute.xlu1 %50 }
  0x87   :  { %v41_v19 = vpop.permute.xlu0 %40 }
  0x89   :  { %v144_v30 = vpop.permute.xlu1 %143 }
  0x8b   :  { %v139_v26 = vpop.permute.xlu0 %138 }
  0xd9   :  { %v223_v13 = vpop.f32.mrb[0].mxu0 }
  0xda   :  { %v119_v14 = vadd.f32 %v223_v13, %v46_v11  ;;  %v110_v15 = vpop.f32.mrb[1].mxu0 }
  0xdb   :  { %v111_v17 = vadd.f32 %v110_v15, %v36_v12  ;;  %v224_v18 = vpop.f32.mrb[2].mxu0 }
  0xdc   :  { %128 = vst.msk [vmem:[%s341_s5 + $0x10] sm:$0xff] %vm125_vm2, %v119_v14  ;;  %v122_v20 = vadd.f32 %v224_v18, %v51_v16  ;;  %v113_v21 = vpop.f32.mrb[3].mxu0 }
  0xdd   :  { %126 = vst.msk [vmem:[%s341_s5] sm:$0xff] %vm125_vm2, %v111_v17  ;;  %v114_v22 = vadd.f32 %v113_v21, %v41_v19 }
  0xde   :  { %129 = vst.msk [vmem:[%s341_s5 + $0x18] sm:$0xff] %vm125_vm2, %v122_v20  ;;  %v133_v23 = vpack.c.bf16 %v122_v20, %v119_v14 }
  0xdf   :  { %127 = vst.msk [vmem:[%s341_s5 + $0x8] sm:$0xff] %vm125_vm2, %v114_v22  ;;  %v132_v24 = vpack.c.bf16 %v114_v22, %v111_v17 }
  0xe1   :  { %226 = vmatpush3.bf16.msra.mxu1 %v132_v24 }
  0xe2   :  { %227 = vmatprep.subr.bf16.mxu1 %v243_v10 }
  0xe5   :  { %228 = vmatpush3.bf16.msra.mxu1 %v133_v23 }
  0xe8   :  { %230 = vmatmul.mubr.msk.bf16.vlgmr.msra.gmra.mrb[0].mxu1 %vm151_vm3, %v241_v25 }
 0x1bb   :  { %v189_v27 = vpop.f32.mrb[0].mxu1 }
 0x1bc   :  { %v190_v28 = vadd.f32 %v189_v27, %v139_v26  ;;  %v231_v29 = vpop.f32.mrb[1].mxu1 }
 0x1bd   :  { %v192_v31 = vpop.f32.mrb[2].mxu1 }
 0x1be   :  { %196 = vst.msk [vmem:[%s342_s6] sm:$0xff] %vm125_vm2, %v190_v28  ;;  %v193_v32 = vadd.f32 %v192_v31, %v144_v30  ;;  %v232_v33 = vpop.f32.mrb[3].mxu1 }
 0x1c0   :  { %197 = vst.msk [vmem:[%s342_s6 + $0x8] sm:$0xff] %vm125_vm2, %v193_v32 }

// kernel: conv_tasnet_forward.5
= control target key start
LH: loop header
LB: loop body
LE: loop exit
PB: predicated region body
PF: predicated region fallthrough
CT: control target
= control target key end

     0   :  { %vm111_vm0 = vcmask 130048   ;;  %s382_s24 = smov 116   ;;  %v383_v4 = vmov 0   ;;  %vm31_vm1 = vcmask 121856   ;;  %v384_v22 = vmov 0.0   ;;  %s491_s0 = inlined_call_operand.vmem [shape: f32[16,54], index: 0, kind: input, shape index: {}]   ;;  %s492_s2 = inlined_call_operand.vmem [shape: bf16[64,16], index: 2, kind: input, shape index: {}]   ;;  %s493_s3 = inlined_call_operand.vmem [shape: f32[64,1], index: 3, kind: input, shape index: {}]   ;;  %s494_s4 = inlined_call_operand.vmem [shape: bf16[16,32], index: 4, kind: input, shape index: {}]   ;;  %s495_s1 = inlined_call_operand.vmem [shape: f32[32,30], index: 1, kind: input, shape index: {}]   ;;  %s496_s5 = inlined_call_operand.vmem [shape: f32[2,16,30], index: 5, kind: output, shape index: {}]  }
   0x1   :  { %v21_v0 = vld [vmem:[%s491_s0] sm:$0xff]  ;;  %v22_v1 = vld [vmem:[%s491_s0 + $0x8] sm:$0xff]  ;;  %376 = vset.pattern.permute.xlu1 %v383_v4  ;;  %375 = vset.pattern.permute.xlu0 %v383_v4  ;;  %v45_v7 = vld [vmem:[%s493_s3 + $0x10] sm:$0xff]  ;;  %vm385_vm2 = vmmov 0   ;;  %vm220_vm3 = vcmask 261120   ;;  %vm265_vm4 = vcmask 244736  }
   0x2   :  { %v370_v2 = vpack.i.bf16 %v22_v1, %v21_v0  ;;  %v377_v3 = vld [vmem:[%s492_s2] sm:$0xff]   ;;  %v44_v5 = vld [vmem:[%s493_s3 + $0x8] sm:$0xff]  ;;  %v46_v9 = vld [vmem:[%s493_s3 + $0x18] sm:$0xff]  ;;  %350 = vmatprep.subr.bf16.mxu1 %v384_v22  ;;  %354 = vmatprep.mubr.msk.bf16.mxu1 %vm385_vm2, %v384_v22 }
   0x3   :  { %342 = vmatprep.mubr.msk.bf16.mxu0 %vm111_vm0, %v377_v3  ;;  %58 = vperm.xlu1 %376, %v44_v5   ;;  %v43_v6 = vld [vmem:[%s493_s3] sm:$0xff]  ;;  %v49_v10 = vld [vmem:[%s493_s3 + $0x30] sm:$0xff]  ;;  %v48_v11 = vld [vmem:[%s493_s3 + $0x28] sm:$0xff] }
   0x4   :  { %371 = vrot.lane.b32.xlu0 %v370_v2, %s382_s24  ;;  %v47_v8 = vld [vmem:[%s493_s3 + $0x20] sm:$0xff]  ;;  %v50_v12 = vld [vmem:[%s493_s3 + $0x38] sm:$0xff]  ;;  %v378_v19 = vld [vmem:[%s492_s2 + $0x8] sm:$0xff]  }
   0x5   :  { %v379_v20 = vld [vmem:[%s492_s2 + $0x10] sm:$0xff]   ;;  %v380_v21 = vld [vmem:[%s492_s2 + $0x18] sm:$0xff]   ;;  %v197_v41 = vld [vmem:[%s495_s1] sm:$0xff] }
   0x6   :  { %v199_v37 = vld [vmem:[%s495_s1 + $0x10] sm:$0xff]  ;;  %v200_v39 = vld [vmem:[%s495_s1 + $0x18] sm:$0xff]  ;;  %v198_v43 = vld [vmem:[%s495_s1 + $0x8] sm:$0xff] }
   0x7   :  { %63 = vperm.xlu1 %376, %v45_v7   ;;  %v381_v3 = vld [vmem:[%s494_s4] sm:$0xff]  }
   0x8   :  { %53 = vperm.xlu0 %375, %v43_v6  }
   0xb   :  { %68 = vperm.xlu1 %376, %v46_v9  }
   0xc   :  { %73 = vperm.xlu0 %375, %v47_v8  }
   0xf   :  { %78 = vperm.xlu1 %376, %v48_v11  }
  0x10   :  { %83 = vperm.xlu0 %375, %v49_v10  }
  0x13   :  { %88 = vperm.xlu1 %376, %v50_v12  }
  0x76   :  { %v372_v13 = vpop.permute.xlu0 %371 }
  0x77   :  { %v374_v14 = vunpack.i.h.bf16 %v372_v13  ;;  %v373_v15 = vunpack.i.l.bf16 %v372_v13 }
  0x79   :  { %v32_v16 = vsel %vm31_vm1, %v21_v0, %v373_v15  ;;  %v33_v17 = vsel %vm31_vm1, %v22_v1, %v374_v14 }
  0x7a   :  { %v42_v18 = vpack.c.bf16 %v33_v17, %v32_v16 }
  0x7c   :  { %340 = vmatprep.subr.bf16.mxu0 %v42_v18 }
  0x7d   :  { %341 = vmatpush3.bf16.msra.mxu0 %v42_v18 }
  0x80   :  { %343 = vmatmul.mubr.msk.bf16.vlgmr.msra.gmra.mrb[0].mxu0 %vm111_vm0, %v378_v19 }
  0x81   :  { %346 = vmatprep.mubr.msk.bf16.mxu0 %vm111_vm0, %v379_v20 }
  0x82   :  { %v59_v23 = vpop.permute.xlu1 %58 }
  0x86   :  { %v64_v24 = vpop.permute.xlu1 %63 }
  0x87   :  { %v54_v25 = vpop.permute.xlu0 %53 }
  0x88   :  { %347 = vmatmul.mubr.msk.bf16.gmra.mrb[4].mxu0 %vm111_vm0, %v380_v21 }
  0x8a   :  { %v69_v26 = vpop.permute.xlu1 %68 }
  0x8b   :  { %v74_v30 = vpop.permute.xlu0 %73 }
  0x8e   :  { %v79_v36 = vpop.permute.xlu1 %78 }
  0x8f   :  { %v84_v48 = vpop.permute.xlu0 %83 }
  0x92   :  { %v89_v54 = vpop.permute.xlu1 %88 }
 0x153   :  { %v344_v27 = vpop.f32.mrb[0].mxu0 }
 0x154   :  { %v167_v28 = vadd.f32 %v344_v27, %v64_v24  ;;  %v158_v29 = vpop.f32.mrb[1].mxu0 }
 0x155   :  { %v159_v31 = vadd.f32 %v158_v29, %v54_v25  ;;  %v345_v32 = vpop.f32.mrb[2].mxu0 }
 0x156   :  { %v191_v33 = vmax.f32 %v167_v28, 0.0  ;;  %v170_v34 = vadd.f32 %v345_v32, %v69_v26  ;;  %v161_v35 = vpop.f32.mrb[3].mxu0 }
 0x157   :  { %v189_v38 = vmax.f32 %v159_v31, 0.0  ;;  %v162_v40 = vadd.f32 %v161_v35, %v59_v23 }
 0x158   :  { %v192_v42 = vmax.f32 %v170_v34, 0.0  ;;  %v203_v45 = vmul.f32 %v199_v37, %v191_v33 }
 0x159   :  { %v190_v44 = vmax.f32 %v162_v40, 0.0  ;;  %v201_v47 = vmul.f32 %v197_v41, %v189_v38 }
 0x15a   :  { %v204_v46 = vmul.f32 %v200_v39, %v192_v42 }
 0x15b   :  { %v202_v49 = vmul.f32 %v198_v43, %v190_v44  ;;  %v348_v50 = vpop.f32.mrb[4].mxu0 }
 0x15c   :  { %v183_v51 = vadd.f32 %v348_v50, %v84_v48  ;;  %v174_v52 = vpop.f32.mrb[5].mxu0  ;;  %v210_v53 = vpack.c.bf16 %v204_v46, %v203_v45 }
 0x15d   :  { %v175_v55 = vadd.f32 %v174_v52, %v74_v30  ;;  %v349_v56 = vpop.f32.mrb[6].mxu0  ;;  %v209_v57 = vpack.c.bf16 %v202_v49, %v201_v47 }
 0x15e   :  { %v195_v58 = vmax.f32 %v183_v51, 0.0  ;;  %v186_v59 = vadd.f32 %v349_v56, %v89_v54  ;;  %v177_v60 = vpop.f32.mrb[7].mxu0 }
 0x15f   :  { %v193_v61 = vmax.f32 %v175_v55, 0.0  ;;  %v178_v62 = vadd.f32 %v177_v60, %v79_v36  ;;  %351 = vmatpush3.bf16.msra.mxu1 %v209_v57 }
 0x160   :  { %v196_v63 = vmax.f32 %v186_v59, 0.0  ;;  %352 = vmatprep.subr.bf16.mxu1 %v384_v22  ;;  %v207_v1 = vmul.f32 %v199_v37, %v195_v58 }
 0x161   :  { %v194_v0 = vmax.f32 %v178_v62, 0.0  ;;  %v205_v4 = vmul.f32 %v197_v41, %v193_v61 }
 0x162   :  { %v208_v2 = vmul.f32 %v200_v39, %v196_v63 }
 0x163   :  { %v206_v5 = vmul.f32 %v198_v43, %v194_v0  ;;  %353 = vmatpush3.bf16.msra.mxu1 %v210_v53 }
 0x164   :  { %v212_v6 = vpack.c.bf16 %v208_v2, %v207_v1  ;;  %358 = vmatprep.subr.bf16.mxu1 %v384_v22 }
 0x165   :  { %v211_v7 = vpack.c.bf16 %v206_v5, %v205_v4 }
 0x166   :  { %355 = vmatmul.mubr.msk.bf16.vlgmr.msra.gmra.mrb[0].mxu1 %vm220_vm3, %v381_v3 }
 0x167   :  { %359 = vmatpush3.bf16.msra.mxu1 %v211_v7  ;;  %362 = vmatprep.mubr.msk.bf16.mxu1 %vm385_vm2, %v384_v22 }
 0x168   :  { %360 = vmatprep.subr.bf16.mxu1 %v384_v22 }
 0x16b   :  { %361 = vmatpush3.bf16.msra.mxu1 %v212_v6 }
 0x16e   :  { %363 = vmatmul.mubr.msk.bf16.vlgmr.msra.gmra.mrb[4].mxu1 %vm220_vm3, %v381_v3 }
 0x239   :  { %v258_v8 = vpop.f32.mrb[0].mxu1 }
 0x23a   :  { %266 = vst.msk [vmem:[%s496_s5] sm:$0xff] %vm265_vm4, %v258_v8  ;;  %v356_v9 = vpop.f32.mrb[1].mxu1 }
 0x23b   :  { %v261_v10 = vpop.f32.mrb[2].mxu1 }
 0x23c   :  { %267 = vst.msk [vmem:[%s496_s5 + $0x8] sm:$0xff] %vm265_vm4, %v261_v10  ;;  %v357_v11 = vpop.f32.mrb[3].mxu1 }
 0x241   :  { %v302_v12 = vpop.f32.mrb[4].mxu1 }
 0x242   :  { %327 = vst.msk [vmem:[%s496_s5 + $0x10] sm:$0xff] %vm265_vm4, %v302_v12  ;;  %v364_v13 = vpop.f32.mrb[5].mxu1 }
 0x243   :  { %v305_v14 = vpop.f32.mrb[6].mxu1 }
 0x244   :  { %328 = vst.msk [vmem:[%s496_s5 + $0x18] sm:$0xff] %vm265_vm4, %v305_v14  ;;  %v365_v15 = vpop.f32.mrb[7].mxu1 }

// kernel: conv_tasnet_forward.4
= control target key start
LH: loop header
LB: loop body
LE: loop exit
PB: predicated region body
PF: predicated region fallthrough
CT: control target
= control target key end

     0   :  { %s1455_s9 = smov 115   ;;  %s1456_s10 = smov 2   ;;  %v1457_v3 = vmov 0.0   ;;  %vm40_vm0 = vcmask 15360   ;;  %vm43_vm1 = vcmask 138240   ;;  %vm1460_vm2 = vmmov 0   ;;  %s1799_s0 = inlined_call_operand.vmem [shape: f32[16,30], index: 0, kind: input, shape index: {}]   ;;  %s1800_s1 = inlined_call_operand.vmem [shape: bf16[4,16,48], index: 1, kind: input, shape index: {}]   ;;  %s1801_s2 = inlined_call_operand.vmem [shape: f32[4,16,1], index: 2, kind: input, shape index: {}]   ;;  %s1802_s3 = inlined_call_operand.vmem [shape: f32[4,16,1], index: 3, kind: input, shape index: {}]   ;;  %s1803_s4 = inlined_call_operand.vmem [shape: f32[4,16,1], index: 4, kind: input, shape index: {}]   ;;  %s1804_s7 = inlined_call_operand.vmem [shape: f32[4,16,1], index: 7, kind: input, shape index: {}]   ;;  %s1805_s5 = inlined_call_operand.vmem [shape: f32[4,1,1], index: 5, kind: input, shape index: {}]   ;;  %s1806_s6 = inlined_call_operand.vmem [shape: bf16[4,16,16], index: 6, kind: input, shape index: {}]   ;;  %s1807_s8 = inlined_call_operand.vmem [shape: f32[16,54], index: 8, kind: output, shape index: {}]  }
   0x1   :  { %v30_v0 = vld [vmem:[%s1799_s0] sm:$0xff]  ;;  %v31_v1 = vld [vmem:[%s1799_s0 + $0x8] sm:$0xff]  ;;  %1206 = vmatprep.subr.bf16.mxu0 %v1457_v3  ;;  %1216 = vmatprep.subr.bf16.mxu1 %v1457_v3  ;;  %s1458_s0 = smov 16   ;;  %s1459_s11 = smov 17   ;;  %v1463_v20 = vmov 0   ;;  %vm118_vm3 = vcmask 392192  }
   0x2   :  { %v1289_v2 = vpack.i.bf16 %v31_v1, %v30_v0  ;;  %1212 = vmatprep.mubr.msk.bf16.mxu0 %vm1460_vm2, %v1457_v3  ;;  %1218 = vmatprep.mubr.msk.bf16.mxu1 %vm1460_vm2, %v1457_v3  ;;  %s1461_s12 = smov 15   ;;  %s1462_s13 = smov 127   ;;  %v102_v21 = vld [vmem:[%s1801_s2 + $0x8] sm:$0xff]  ;;  %v101_v22 = vld [vmem:[%s1801_s2] sm:$0xff]  ;;  %vm163_vm4 = vcmask 277504   ;;  %vm255_vm7 = vcmask 130048  }
   0x3   :  { %1324 = vset.pattern.permute.xlu1 %v1463_v20  ;;  %1325 = vset.pattern.permute.xlu0 %v1463_v20  ;;  %s1464_s16 = smov 126   ;;  %v1431_v47 = vld [vmem:[%s1800_s1] sm:$0xff]   ;;  %v192_v60 = vld [vmem:[%s1802_s3 + $0x8] sm:$0xff]  ;;  %s1465_s19 = smov 4   ;;  %vm308_vm8 = vcmask 31744   ;;  %vm311_vm9 = vcmask 171008  }
   0x4   :  { %1290 = vrot.lane.b32.xlu0 %v1289_v2, %s1455_s9  ;;  %v191_v58 = vld [vmem:[%s1802_s3] sm:$0xff]  ;;  %s1467_s20 = smov 124   ;;  %s1468_s21 = smov 19   ;;  %vm432_vm10 = vcmask 343040   ;;  %vm583_vm13 = vcmask 187392   ;;  %vm704_vm14 = vcmask 375808  }
   0x5   :  { %v205_v59 = vld [vmem:[%s1803_s4] sm:$0xff]  ;;  %s1469_s26 = smov 109   ;;  %s1471_s27 = smov 22  }
   0x8   :  { %1295 = vrot.lane.b32.xlu0 %v1289_v2, %s1456_s10 }
  0x76   :  { %v1291_v4 = vpop.permute.xlu0 %1290 }
  0x77   :  { %v1293_v5 = vunpack.i.h.bf16 %v1291_v4  ;;  %v1292_v6 = vunpack.i.l.bf16 %v1291_v4 }
  0x79   :  { %v53_v7 = vsel %vm40_vm0, 0.0, %v1293_v5  ;;  %v52_v8 = vsel %vm40_vm0, 0.0, %v1292_v6 }
  0x7a   :  { %v55_v9 = vsel %vm43_vm1, %v53_v7, 0.0  ;;  %v54_v10 = vsel %vm43_vm1, %v52_v8, 0.0  ;;  %v1296_v11 = vpop.permute.xlu0 %1295  ;;  %v206_v8 = vld [vmem:[%s1803_s4 + $0x8] sm:$0xff] }
  0x7b   :  { %v1298_v12 = vunpack.i.h.bf16 %v1296_v11  ;;  %v1297_v13 = vunpack.i.l.bf16 %v1296_v11  ;;  %v1309_v14 = vpack.i.bf16 %v55_v9, %v54_v10  ;;  %v238_v9 = vld [vmem:[%s1804_s7] sm:$0xff]  ;;  %v239_v11 = vld [vmem:[%s1804_s7 + $0x8] sm:$0xff] }
  0x7c   :  { %v1125_v10 = vld [vmem:[%s1805_s5] ss:$0 sm:$0xff] }
  0x7d   :  { %v42_v15 = vsel %vm40_vm0, 0.0, %v1298_v12  ;;  %v41_v16 = vsel %vm40_vm0, 0.0, %v1297_v13  ;;  %1310 = vrot.lane.b32.xlu0 %v1309_v14, %s1458_s0  ;;  %1300 = vrot.lane.b32.xlu1 %v1309_v14, %s1459_s11 }
  0x7e   :  { %v45_v17 = vsel %vm43_vm1, %v42_v15, 0.0  ;;  %v44_v18 = vsel %vm43_vm1, %v41_v16, 0.0 }
  0x7f   :  { %v1304_v19 = vpack.i.bf16 %v45_v17, %v44_v18 }
  0x81   :  { %1320 = vrot.lane.b32.xlu0 %v1309_v14, %s1461_s12  ;;  %1305 = vrot.lane.b32.xlu1 %v1304_v19, %s1462_s13 }
  0x85   :  { %1315 = vrot.lane.b32.xlu1 %v1304_v19, %s1464_s16  ;;  %110 = vperm.xlu0 %1325, %v102_v21  }
  0x89   :  { %105 = vperm.xlu1 %1324, %v101_v22  }
  0xef   :  { %v1311_v23 = vpop.permute.xlu0 %1310  ;;  %v1301_v24 = vpop.permute.xlu1 %1300 }
  0xf0   :  { %v1303_v25 = vunpack.i.h.bf16 %v1301_v24  ;;  %v1302_v26 = vunpack.i.l.bf16 %v1301_v24  ;;  %v1313_v31 = vunpack.i.h.bf16 %v1311_v23  ;;  %v1312_v32 = vunpack.i.l.bf16 %v1311_v23 }
  0xf2   :  { %v64_v27 = vsel %vm43_vm1, %v44_v18, %v1302_v26  ;;  %v65_v28 = vsel %vm43_vm1, %v45_v17, %v1303_v25 }
  0xf3   :  { %v1306_v29 = vpop.permute.xlu1 %1305  ;;  %v96_v30 = vpack.c.bf16 %v65_v28, %v64_v27  ;;  %v1321_v35 = vpop.permute.xlu0 %1320 }
  0xf4   :  { %v1308_v33 = vunpack.i.h.bf16 %v1306_v29  ;;  %v1307_v34 = vunpack.i.l.bf16 %v1306_v29  ;;  %v1323_v40 = vunpack.i.h.bf16 %v1321_v35  ;;  %v1322_v41 = vunpack.i.l.bf16 %v1321_v35 }
  0xf5   :  { %1207 = vmatpush3.bf16.msra.mxu0 %v96_v30 }
  0xf6   :  { %1208 = vmatprep.subr.bf16.mxu0 %v1457_v3  ;;  %v80_v36 = vsel %vm43_vm1, %v1307_v34, %v1312_v32  ;;  %v81_v37 = vsel %vm43_vm1, %v1308_v33, %v1313_v31 }
  0xf7   :  { %v1316_v38 = vpop.permute.xlu1 %1315  ;;  %v97_v39 = vpack.c.bf16 %v81_v37, %v80_v36  ;;  %v1432_v36 = vld [vmem:[%s1806_s6] sm:$0xff]  }
  0xf8   :  { %v1318_v42 = vunpack.i.h.bf16 %v1316_v38  ;;  %v1317_v43 = vunpack.i.l.bf16 %v1316_v38 }
  0xf9   :  { %1209 = vmatpush3.bf16.msra.mxu0 %v97_v39 }
  0xfa   :  { %1210 = vmatprep.subr.bf16.mxu0 %v1457_v3  ;;  %v94_v44 = vsel %vm43_vm1, %v1317_v43, %v1322_v41  ;;  %v95_v45 = vsel %vm43_vm1, %v1318_v42, %v1323_v40  ;;  %vm855_vm1 = vcmask 220160  }
  0xfb   :  { %v98_v46 = vpack.c.bf16 %v95_v45, %v94_v44 }
  0xfd   :  { %1211 = vmatpush3.bf16.msra.mxu0 %v98_v46 }
  0xfe   :  { %1232 = vmatprep.subr.bf16.mxu0 %v1457_v3 }
 0x100   :  { %1213 = vmatmul.mubr.msk.bf16.vlgmr.msra.gmra.mrb[0].mxu0 %vm118_vm3, %v1431_v47 }
 0x101   :  { %1234 = vmatprep.mubr.msk.bf16.mxu0 %vm1460_vm2, %v1457_v3 }
 0x104   :  { %v111_v50 = vpop.permute.xlu0 %110 }
 0x108   :  { %v106_v48 = vpop.permute.xlu1 %105 }
 0x1d3   :  { %v156_v49 = vpop.f32.mrb[0].mxu0 }
 0x1d4   :  { %v157_v51 = vadd.f32 %v156_v49, %v106_v48  ;;  %v1214_v52 = vpop.f32.mrb[1].mxu0 }
 0x1d5   :  { %v159_v53 = vpop.f32.mrb[2].mxu0 }
 0x1d6   :  { %v160_v54 = vadd.f32 %v159_v53, %v111_v50  ;;  %v1215_v55 = vpop.f32.mrb[3].mxu0  ;;  %v164_v56 = vsel %vm163_vm4, %v157_v51, 0.0 }
 0x1d7   :  { %165 = vadd.xlane.f32.xlu1 %v164_v56 }
 0x1d8   :  { %v167_v57 = vsel %vm163_vm4, %v160_v54, 0.0 }
 0x1d9   :  { %168 = vadd.xlane.f32.xlu0 %v167_v57 }
 0x1e8   :  { %195 = vperm.xlu1 %1324, %v191_v58  }
 0x1ec   :  { %209 = vperm.xlu1 %1324, %v205_v59  }
 0x1ef   :  { %200 = vperm.xlu0 %1325, %v192_v60  }
 0x264   :  { %v166_v61 = vpop.xlane.xlu1 %165 }
 0x265   :  { %v171_v62 = vmul.f32 0.029411765, %v166_v61 }
 0x266   :  { %v169_v63 = vpop.xlane.xlu0 %168 }
 0x267   :  { %v173_v0 = vsub.f32 %v157_v51, %v171_v62  ;;  %v172_v1 = vmul.f32 0.029411765, %v169_v63  ;;  %v1130_v62 = vld [vmem:[%s1801_s2 + $0x10] sm:$0xff]  ;;  %v1131_v63 = vld [vmem:[%s1801_s2 + $0x18] sm:$0xff] }
 0x268   :  { %v196_v12 = vpop.permute.xlu1 %195 }
 0x269   :  { %v174_v2 = vsub.f32 %v160_v54, %v172_v1  ;;  %v175_v4 = vmul.f32 %v173_v0, %v173_v0 }
 0x26b   :  { %v177_v5 = vsel %vm163_vm4, %v175_v4, 0.0  ;;  %v176_v6 = vmul.f32 %v174_v2, %v174_v2 }
 0x26c   :  { %178 = vadd.xlane.f32.xlu1 %v177_v5  ;;  %v210_v13 = vpop.permute.xlu1 %209 }
 0x26d   :  { %v180_v7 = vsel %vm163_vm4, %v176_v6, 0.0 }
 0x26e   :  { %181 = vadd.xlane.f32.xlu0 %v180_v7  ;;  %v201_v14 = vpop.permute.xlu0 %200 }
 0x27d   :  { %214 = vperm.xlu1 %1324, %v206_v8  }
 0x281   :  { %242 = vperm.xlu1 %1324, %v238_v9  }
 0x284   :  { %228 = vperm.xlu0 %1325, %v1125_v10  }
 0x288   :  { %247 = vperm.xlu0 %1325, %v239_v11  }
 0x2f9   :  { %v179_v15 = vpop.xlane.xlu1 %178 }
 0x2fa   :  { %v183_v16 = vmul.f32 0.029411765, %v179_v15 }
 0x2fb   :  { %v182_v17 = vpop.xlane.xlu0 %181 }
 0x2fc   :  { %v185_v18 = vadd.f32 1e-05, %v183_v16  ;;  %v184_v19 = vmul.f32 0.029411765, %v182_v17 }
 0x2fd   :  { %v215_v28 = vpop.permute.xlu1 %214 }
 0x2fe   :  { %1439 = vrsqrt.f32 %v185_v18  ;;  %v186_v20 = vadd.f32 1e-05, %v184_v19 }
 0x300   :  { %1441 = vrsqrt.f32 %v186_v20 }
 0x301   :  { %v243_v38 = vpop.permute.xlu1 %242 }
 0x303   :  { %v229_v29 = vpop.permute.xlu0 %228 }
 0x307   :  { %v248_v40 = vpop.permute.xlu0 %247 }
 0x308   :  { %v1440_v21 = vpop.eup %1439 }
 0x309   :  { %v189_v22 = vmul.f32 %v1440_v21, %v173_v0 }
 0x30a   :  { %v1442_v23 = vpop.eup %1441 }
 0x30b   :  { %v190_v24 = vmul.f32 %v1442_v23, %v174_v2  ;;  %v203_v25 = vmul.f32 %v196_v12, %v189_v22 }
 0x30d   :  { %v204_v26 = vmul.f32 %v201_v14, %v190_v24  ;;  %v217_v27 = vadd.f32 %v210_v13, %v203_v25  ;;  %v1433_v25 = vld [vmem:[%s1800_s1 + $0x8] sm:$0xff]  }
 0x30f   :  { %v218_v30 = vadd.f32 %v215_v28, %v204_v26  ;;  %v231_v31 = vmul.f32 %v229_v29, %v217_v27  ;;  %vm219_vm5 = vcmp.ge.f32.partialorder %v217_v27, 0.0 }
 0x311   :  { %v232_v32 = vmul.f32 %v229_v29, %v218_v30  ;;  %vm220_vm6 = vcmp.ge.f32.partialorder %v218_v30, 0.0  ;;  %v233_v33 = vsel %vm219_vm5, %v217_v27, %v231_v31 }
 0x313   :  { %v234_v34 = vsel %vm220_vm6, %v218_v30, %v232_v32 }
 0x314   :  { %v237_v35 = vpack.c.bf16 %v234_v34, %v233_v33 }
 0x316   :  { %1217 = vmatpush3.bf16.msra.mxu1 %v237_v35 }
 0x317   :  { %1222 = vmatprep.subr.bf16.mxu1 %v1457_v3 }
 0x319   :  { %1219 = vmatmul.mubr.msk.bf16.vlgmr.msra.gmra.mrb[0].mxu1 %vm255_vm7, %v1432_v36  ;;  %v1134_v36 = vld [vmem:[%s1802_s3 + $0x10] sm:$0xff] }
 0x31a   :  { %1228 = vmatprep.mubr.msk.bf16.mxu1 %vm1460_vm2, %v1457_v3 }
 0x3ec   :  { %v293_v37 = vpop.f32.mrb[0].mxu1 }
 0x3ed   :  { %v1220_v39 = vpop.f32.mrb[1].mxu1  ;;  %v294_v42 = vadd.f32 %v293_v37, %v243_v38  ;;  %v1135_v37 = vld [vmem:[%s1802_s3 + $0x18] sm:$0xff]  ;;  %v1136_v38 = vld [vmem:[%s1803_s4 + $0x10] sm:$0xff] }
 0x3ee   :  { %v296_v41 = vpop.f32.mrb[2].mxu1  ;;  %v1137_v39 = vld [vmem:[%s1803_s4 + $0x18] sm:$0xff] }
 0x3ef   :  { %v297_v43 = vadd.f32 %v296_v41, %v248_v40  ;;  %v1221_v44 = vpop.f32.mrb[3].mxu1  ;;  %v1142_v40 = vld [vmem:[%s1804_s7 + $0x10] sm:$0xff] }
 0x3f1   :  { %v1331_v45 = vpack.i.bf16 %v297_v43, %v294_v42 }
 0x3f3   :  { %1332 = vrot.lane.b32.xlu0 %v1331_v45, %s1465_s19  ;;  %1327 = vrot.lane.b32.xlu1 %v1331_v45, %s1455_s9  ;;  %s1466_s9 = smov 21  }
 0x465   :  { %v1333_v46 = vpop.permute.xlu0 %1332  ;;  %v1328_v47 = vpop.permute.xlu1 %1327 }
 0x466   :  { %v1335_v48 = vunpack.i.h.bf16 %v1333_v46  ;;  %v1334_v49 = vunpack.i.l.bf16 %v1333_v46  ;;  %v1330_v50 = vunpack.i.h.bf16 %v1328_v47  ;;  %v1329_v51 = vunpack.i.l.bf16 %v1328_v47 }
 0x468   :  { %v310_v52 = vsel %vm308_vm8, 0.0, %v1335_v48  ;;  %v309_v53 = vsel %vm308_vm8, 0.0, %v1334_v49  ;;  %v321_v54 = vsel %vm308_vm8, 0.0, %v1330_v50  ;;  %v320_v55 = vsel %vm308_vm8, 0.0, %v1329_v51  ;;  %v1139_v51 = vld [vmem:[%s1805_s5 + $0x1] ss:$0 sm:$0xff] }
 0x469   :  { %v313_v56 = vsel %vm311_vm9, %v310_v52, 0.0  ;;  %v312_v57 = vsel %vm311_vm9, %v309_v53, 0.0  ;;  %v323_v58 = vsel %vm311_vm9, %v321_v54, 0.0  ;;  %v322_v59 = vsel %vm311_vm9, %v320_v55, 0.0  ;;  %v1143_v52 = vld [vmem:[%s1804_s7 + $0x18] sm:$0xff] }
 0x46a   :  { %v1341_v60 = vpack.i.bf16 %v313_v56, %v312_v57  ;;  %v1336_v61 = vpack.i.bf16 %v323_v58, %v322_v59 }
 0x46c   :  { %1342 = vrot.lane.b32.xlu0 %v1341_v60, %s1464_s16  ;;  %1337 = vrot.lane.b32.xlu1 %v1336_v61, %s1466_s9 }
 0x470   :  { %1352 = vrot.lane.b32.xlu0 %v1341_v60, %s1467_s20  ;;  %1347 = vrot.lane.b32.xlu1 %v1336_v61, %s1468_s21 }
 0x474   :  { %375 = vperm.xlu0 %1325, %v1130_v62   ;;  %1357 = vrot.lane.b32.xlu1 %v1336_v61, %s1459_s11 }
 0x478   :  { %380 = vperm.xlu1 %1324, %v1131_v63  }
 0x4de   :  { %v1343_v0 = vpop.permute.xlu0 %1342  ;;  %v1338_v1 = vpop.permute.xlu1 %1337 }
 0x4df   :  { %v1340_v2 = vunpack.i.h.bf16 %v1338_v1  ;;  %v1339_v4 = vunpack.i.l.bf16 %v1338_v1  ;;  %v1345_v9 = vunpack.i.h.bf16 %v1343_v0  ;;  %v1344_v10 = vunpack.i.l.bf16 %v1343_v0 }
 0x4e1   :  { %v333_v5 = vsel %vm311_vm9, %v313_v56, %v1340_v2  ;;  %v332_v6 = vsel %vm311_vm9, %v312_v57, %v1339_v4 }
 0x4e2   :  { %v364_v7 = vpack.c.bf16 %v333_v5, %v332_v6  ;;  %v1348_v8 = vpop.permute.xlu1 %1347  ;;  %v1353_v13 = vpop.permute.xlu0 %1352 }
 0x4e3   :  { %v1350_v11 = vunpack.i.h.bf16 %v1348_v8  ;;  %v1349_v12 = vunpack.i.l.bf16 %v1348_v8  ;;  %v1355_v18 = vunpack.i.h.bf16 %v1353_v13  ;;  %v1354_v19 = vunpack.i.l.bf16 %v1353_v13 }
 0x4e4   :  { %1223 = vmatpush3.bf16.msra.mxu1 %v364_v7 }
 0x4e5   :  { %v349_v14 = vsel %vm311_vm9, %v1345_v9, %v1350_v11  ;;  %v348_v15 = vsel %vm311_vm9, %v1344_v10, %v1349_v12  ;;  %1224 = vmatprep.subr.bf16.mxu1 %v1457_v3 }
 0x4e6   :  { %v365_v16 = vpack.c.bf16 %v349_v14, %v348_v15  ;;  %v1358_v17 = vpop.permute.xlu1 %1357  ;;  %v1434_v14 = vld [vmem:[%s1806_s6 + $0x8] sm:$0xff]  }
 0x4e7   :  { %v1360_v20 = vunpack.i.h.bf16 %v1358_v17  ;;  %v1359_v21 = vunpack.i.l.bf16 %v1358_v17 }
 0x4e8   :  { %1225 = vmatpush3.bf16.msra.mxu1 %v365_v16 }
 0x4e9   :  { %v363_v22 = vsel %vm311_vm9, %v1355_v18, %v1360_v20  ;;  %v362_v23 = vsel %vm311_vm9, %v1354_v19, %v1359_v21  ;;  %1226 = vmatprep.subr.bf16.mxu1 %v1457_v3 }
 0x4ea   :  { %v366_v24 = vpack.c.bf16 %v363_v22, %v362_v23 }
 0x4ec   :  { %1227 = vmatpush3.bf16.msra.mxu1 %v366_v24 }
 0x4ed   :  { %1238 = vmatprep.subr.bf16.mxu1 %v1457_v3 }
 0x4ef   :  { %1229 = vmatmul.mubr.msk.bf16.vlgmr.msra.gmra.mrb[4].mxu1 %vm118_vm3, %v1433_v25 }
 0x4f0   :  { %1244 = vmatprep.mubr.msk.bf16.mxu1 %vm1460_vm2, %v1457_v3 }
 0x4f3   :  { %v376_v26 = vpop.permute.xlu0 %375 }
 0x4f7   :  { %v381_v30 = vpop.permute.xlu1 %380 }
 0x5c2   :  { %v425_v27 = vpop.f32.mrb[4].mxu1 }
 0x5c3   :  { %v426_v28 = vadd.f32 %v425_v27, %v376_v26  ;;  %v1230_v29 = vpop.f32.mrb[5].mxu1 }
 0x5c4   :  { %v428_v31 = vpop.f32.mrb[6].mxu1 }
 0x5c5   :  { %v429_v32 = vadd.f32 %v428_v31, %v381_v30  ;;  %v1231_v33 = vpop.f32.mrb[7].mxu1  ;;  %v433_v34 = vsel %vm432_vm10, %v426_v28, 0.0 }
 0x5c6   :  { %434 = vadd.xlane.f32.xlu0 %v433_v34 }
 0x5c7   :  { %v436_v35 = vsel %vm432_vm10, %v429_v32, 0.0 }
 0x5c8   :  { %437 = vadd.xlane.f32.xlu1 %v436_v35 }
 0x5d9   :  { %465 = vperm.xlu1 %1324, %v1134_v36  }
 0x5dc   :  { %470 = vperm.xlu0 %1325, %v1135_v37  }
 0x5dd   :  { %480 = vperm.xlu1 %1324, %v1136_v38  }
 0x5e1   :  { %485 = vperm.xlu1 %1324, %v1137_v39  }
 0x5e5   :  { %516 = vperm.xlu1 %1324, %v1142_v40   ;;  %v1148_v40 = vld [vmem:[%s1801_s2 + $0x20] sm:$0xff] }
 0x653   :  { %v435_v41 = vpop.xlane.xlu0 %434 }
 0x654   :  { %v440_v42 = vmul.f32 0.023809524, %v435_v41  ;;  %v1149_v41 = vld [vmem:[%s1801_s2 + $0x28] sm:$0xff] }
 0x655   :  { %v438_v43 = vpop.xlane.xlu1 %437 }
 0x656   :  { %v442_v44 = vsub.f32 %v426_v28, %v440_v42  ;;  %v441_v45 = vmul.f32 0.023809524, %v438_v43 }
 0x658   :  { %v443_v46 = vsub.f32 %v429_v32, %v441_v45  ;;  %v444_v47 = vmul.f32 %v442_v44, %v442_v44 }
 0x659   :  { %v466_v60 = vpop.permute.xlu1 %465 }
 0x65a   :  { %v446_v48 = vsel %vm432_vm10, %v444_v47, 0.0  ;;  %v445_v49 = vmul.f32 %v443_v46, %v443_v46 }
 0x65b   :  { %447 = vadd.xlane.f32.xlu0 %v446_v48  ;;  %v471_v53 = vpop.permute.xlu0 %470 }
 0x65c   :  { %v449_v50 = vsel %vm432_vm10, %v445_v49, 0.0 }
 0x65d   :  { %v481_v63 = vpop.permute.xlu1 %480 }
 0x65f   :  { %450 = vadd.xlane.f32.xlu0 %v449_v50 }
 0x661   :  { %v486_v6 = vpop.permute.xlu1 %485 }
 0x665   :  { %v517_v16 = vpop.permute.xlu1 %516 }
 0x675   :  { %500 = vperm.xlu0 %1325, %v1139_v51  }
 0x679   :  { %521 = vperm.xlu0 %1325, %v1143_v52  }
 0x6e8   :  { %v448_v54 = vpop.xlane.xlu0 %447 }
 0x6e9   :  { %v452_v55 = vmul.f32 0.023809524, %v448_v54 }
 0x6eb   :  { %v454_v56 = vadd.f32 1e-05, %v452_v55 }
 0x6ec   :  { %v451_v57 = vpop.xlane.xlu0 %450 }
 0x6ed   :  { %1443 = vrsqrt.f32 %v454_v56  ;;  %v453_v58 = vmul.f32 0.023809524, %v451_v57 }
 0x6ef   :  { %v455_v59 = vadd.f32 1e-05, %v453_v58 }
 0x6f1   :  { %1445 = vrsqrt.f32 %v455_v59 }
 0x6f4   :  { %v501_v7 = vpop.permute.xlu0 %500 }
 0x6f7   :  { %v1444_v61 = vpop.eup %1443 }
 0x6f8   :  { %v458_v62 = vmul.f32 %v1444_v61, %v442_v44  ;;  %v522_v18 = vpop.permute.xlu0 %521 }
 0x6fa   :  { %v473_v0 = vmul.f32 %v466_v60, %v458_v62 }
 0x6fb   :  { %v1446_v1 = vpop.eup %1445 }
 0x6fc   :  { %v459_v2 = vmul.f32 %v1446_v1, %v443_v46  ;;  %v488_v4 = vadd.f32 %v481_v63, %v473_v0 }
 0x6fe   :  { %v474_v5 = vmul.f32 %v471_v53, %v459_v2  ;;  %v503_v9 = vmul.f32 %v501_v7, %v488_v4  ;;  %vm490_vm11 = vcmp.ge.f32.partialorder %v488_v4, 0.0  ;;  %v1435_v2 = vld [vmem:[%s1800_s1 + $0x10] sm:$0xff]  }
 0x700   :  { %v489_v8 = vadd.f32 %v486_v6, %v474_v5  ;;  %v505_v11 = vsel %vm490_vm11, %v488_v4, %v503_v9 }
 0x702   :  { %vm491_vm12 = vcmp.ge.f32.partialorder %v489_v8, 0.0  ;;  %v504_v10 = vmul.f32 %v501_v7, %v489_v8 }
 0x704   :  { %v506_v12 = vsel %vm491_vm12, %v489_v8, %v504_v10 }
 0x705   :  { %v510_v13 = vpack.c.bf16 %v506_v12, %v505_v11 }
 0x707   :  { %1233 = vmatpush3.bf16.msra.mxu0 %v510_v13 }
 0x708   :  { %1248 = vmatprep.subr.bf16.mxu0 %v1457_v3 }
 0x70a   :  { %1235 = vmatmul.mubr.msk.bf16.vlgmr.msra.gmra.mrb[4].mxu0 %vm255_vm7, %v1434_v14  ;;  %v1152_v14 = vld [vmem:[%s1802_s3 + $0x20] sm:$0xff] }
 0x70b   :  { %1250 = vmatprep.mubr.msk.bf16.mxu0 %vm1460_vm2, %v1457_v3 }
 0x7dd   :  { %v566_v15 = vpop.f32.mrb[4].mxu0 }
 0x7de   :  { %v1236_v17 = vpop.f32.mrb[5].mxu0  ;;  %v567_v20 = vadd.f32 %v566_v15, %v517_v16  ;;  %v1153_v15 = vld [vmem:[%s1802_s3 + $0x28] sm:$0xff]  ;;  %v1154_v16 = vld [vmem:[%s1803_s4 + $0x20] sm:$0xff] }
 0x7df   :  { %v569_v19 = vpop.f32.mrb[6].mxu0  ;;  %v1155_v17 = vld [vmem:[%s1803_s4 + $0x28] sm:$0xff] }
 0x7e0   :  { %v570_v21 = vadd.f32 %v569_v19, %v522_v18  ;;  %v1237_v22 = vpop.f32.mrb[7].mxu0  ;;  %v1160_v18 = vld [vmem:[%s1804_s7 + $0x20] sm:$0xff] }
 0x7e2   :  { %v1366_v23 = vpack.i.bf16 %v570_v21, %v567_v20 }
 0x7e4   :  { %1367 = vrot.lane.b32.xlu0 %v1366_v23, %s1456_s10  ;;  %1362 = vrot.lane.b32.xlu1 %v1366_v23, %s1469_s26  ;;  %s1470_s10 = smov 23  }
 0x856   :  { %v1368_v24 = vpop.permute.xlu0 %1367  ;;  %v1363_v25 = vpop.permute.xlu1 %1362 }
 0x857   :  { %v1370_v26 = vunpack.i.h.bf16 %v1368_v24  ;;  %v1369_v27 = vunpack.i.l.bf16 %v1368_v24  ;;  %v1365_v28 = vunpack.i.h.bf16 %v1363_v25  ;;  %v1364_v29 = vunpack.i.l.bf16 %v1363_v25 }
 0x859   :  { %v582_v30 = vsel %vm40_vm0, 0.0, %v1370_v26  ;;  %v581_v31 = vsel %vm40_vm0, 0.0, %v1369_v27  ;;  %v593_v32 = vsel %vm40_vm0, 0.0, %v1365_v28  ;;  %v592_v33 = vsel %vm40_vm0, 0.0, %v1364_v29  ;;  %v1157_v29 = vld [vmem:[%s1805_s5 + $0x2] ss:$0 sm:$0xff] }
 0x85a   :  { %v585_v34 = vsel %vm583_vm13, %v582_v30, 0.0  ;;  %v584_v35 = vsel %vm583_vm13, %v581_v31, 0.0  ;;  %v595_v36 = vsel %vm583_vm13, %v593_v32, 0.0  ;;  %v594_v37 = vsel %vm583_vm13, %v592_v33, 0.0  ;;  %v1161_v30 = vld [vmem:[%s1804_s7 + $0x28] sm:$0xff] }
 0x85b   :  { %v1376_v38 = vpack.i.bf16 %v585_v34, %v584_v35  ;;  %v1371_v39 = vpack.i.bf16 %v595_v36, %v594_v37 }
 0x85d   :  { %1377 = vrot.lane.b32.xlu0 %v1376_v38, %s1462_s13  ;;  %1372 = vrot.lane.b32.xlu1 %v1371_v39, %s1470_s10 }
 0x861   :  { %1387 = vrot.lane.b32.xlu0 %v1376_v38, %s1464_s16  ;;  %1382 = vrot.lane.b32.xlu1 %v1371_v39, %s1471_s27 }
 0x865   :  { %647 = vperm.xlu0 %1325, %v1148_v40   ;;  %1392 = vrot.lane.b32.xlu1 %v1371_v39, %s1466_s9 }
 0x869   :  { %652 = vperm.xlu1 %1324, %v1149_v41  }
 0x8cf   :  { %v1378_v42 = vpop.permute.xlu0 %1377  ;;  %v1373_v43 = vpop.permute.xlu1 %1372 }
 0x8d0   :  { %v1375_v44 = vunpack.i.h.bf16 %v1373_v43  ;;  %v1374_v45 = vunpack.i.l.bf16 %v1373_v43  ;;  %v1380_v50 = vunpack.i.h.bf16 %v1378_v42  ;;  %v1379_v51 = vunpack.i.l.bf16 %v1378_v42 }
 0x8d2   :  { %v605_v46 = vsel %vm583_vm13, %v585_v34, %v1375_v44  ;;  %v604_v47 = vsel %vm583_vm13, %v584_v35, %v1374_v45 }
 0x8d3   :  { %v636_v48 = vpack.c.bf16 %v605_v46, %v604_v47  ;;  %v1383_v49 = vpop.permute.xlu1 %1382  ;;  %v1388_v54 = vpop.permute.xlu0 %1387 }
 0x8d4   :  { %v1385_v52 = vunpack.i.h.bf16 %v1383_v49  ;;  %v1384_v53 = vunpack.i.l.bf16 %v1383_v49  ;;  %v1390_v59 = vunpack.i.h.bf16 %v1388_v54  ;;  %v1389_v60 = vunpack.i.l.bf16 %v1388_v54 }
 0x8d5   :  { %1239 = vmatpush3.bf16.msra.mxu1 %v636_v48 }
 0x8d6   :  { %v621_v55 = vsel %vm583_vm13, %v1380_v50, %v1385_v52  ;;  %v620_v56 = vsel %vm583_vm13, %v1379_v51, %v1384_v53  ;;  %1240 = vmatprep.subr.bf16.mxu1 %v1457_v3 }
 0x8d7   :  { %v637_v57 = vpack.c.bf16 %v621_v55, %v620_v56  ;;  %v1393_v58 = vpop.permute.xlu1 %1392  ;;  %v1436_v55 = vld [vmem:[%s1806_s6 + $0x10] sm:$0xff]  }
 0x8d8   :  { %v1395_v61 = vunpack.i.h.bf16 %v1393_v58  ;;  %v1394_v62 = vunpack.i.l.bf16 %v1393_v58 }
 0x8d9   :  { %1241 = vmatpush3.bf16.msra.mxu1 %v637_v57 }
 0x8da   :  { %v635_v63 = vsel %vm583_vm13, %v1390_v59, %v1395_v61  ;;  %v634_v0 = vsel %vm583_vm13, %v1389_v60, %v1394_v62  ;;  %1242 = vmatprep.subr.bf16.mxu1 %v1457_v3 }
 0x8db   :  { %v638_v1 = vpack.c.bf16 %v635_v63, %v634_v0 }
 0x8dd   :  { %1243 = vmatpush3.bf16.msra.mxu1 %v638_v1 }
 0x8de   :  { %1264 = vmatprep.subr.bf16.mxu1 %v1457_v3 }
 0x8e0   :  { %1245 = vmatmul.mubr.msk.bf16.vlgmr.msra.gmra.mrb[8].mxu1 %vm118_vm3, %v1435_v2 }
 0x8e1   :  { %1266 = vmatprep.mubr.msk.bf16.mxu1 %vm1460_vm2, %v1457_v3 }
 0x8e4   :  { %v648_v4 = vpop.permute.xlu0 %647 }
 0x8e8   :  { %v653_v8 = vpop.permute.xlu1 %652 }
 0x9b3   :  { %v697_v5 = vpop.f32.mrb[8].mxu1 }
 0x9b4   :  { %v698_v6 = vadd.f32 %v697_v5, %v648_v4  ;;  %v1246_v7 = vpop.f32.mrb[9].mxu1 }
 0x9b5   :  { %v700_v9 = vpop.f32.mrb[10].mxu1 }
 0x9b6   :  { %v701_v10 = vadd.f32 %v700_v9, %v653_v8  ;;  %v1247_v11 = vpop.f32.mrb[11].mxu1  ;;  %v705_v12 = vsel %vm704_vm14, %v698_v6, 0.0 }
 0x9b7   :  { %706 = vadd.xlane.f32.xlu0 %v705_v12 }
 0x9b8   :  { %v708_v13 = vsel %vm704_vm14, %v701_v10, 0.0 }
 0x9b9   :  { %709 = vadd.xlane.f32.xlu1 %v708_v13 }
 0x9ca   :  { %737 = vperm.xlu1 %1324, %v1152_v14  }
 0x9cd   :  { %742 = vperm.xlu0 %1325, %v1153_v15  }
 0x9ce   :  { %752 = vperm.xlu1 %1324, %v1154_v16  }
 0x9d2   :  { %757 = vperm.xlu1 %1324, %v1155_v17  }
 0x9d6   :  { %788 = vperm.xlu1 %1324, %v1160_v18   ;;  %v1166_v18 = vld [vmem:[%s1801_s2 + $0x30] sm:$0xff] }
 0xa44   :  { %v707_v19 = vpop.xlane.xlu0 %706 }
 0xa45   :  { %v712_v20 = vmul.f32 0.02173913, %v707_v19  ;;  %v1167_v19 = vld [vmem:[%s1801_s2 + $0x38] sm:$0xff] }
 0xa46   :  { %v710_v21 = vpop.xlane.xlu1 %709 }
 0xa47   :  { %v714_v22 = vsub.f32 %v698_v6, %v712_v20  ;;  %v713_v23 = vmul.f32 0.02173913, %v710_v21 }
 0xa49   :  { %v715_v24 = vsub.f32 %v701_v10, %v713_v23  ;;  %v716_v25 = vmul.f32 %v714_v22, %v714_v22 }
 0xa4a   :  { %v738_v38 = vpop.permute.xlu1 %737 }
 0xa4b   :  { %v718_v26 = vsel %vm704_vm14, %v716_v25, 0.0  ;;  %v717_v27 = vmul.f32 %v715_v24, %v715_v24 }
 0xa4c   :  { %719 = vadd.xlane.f32.xlu0 %v718_v26  ;;  %v743_v31 = vpop.permute.xlu0 %742 }
 0xa4d   :  { %v721_v28 = vsel %vm704_vm14, %v717_v27, 0.0 }
 0xa4e   :  { %v753_v41 = vpop.permute.xlu1 %752 }
 0xa50   :  { %722 = vadd.xlane.f32.xlu0 %v721_v28 }
 0xa52   :  { %v758_v47 = vpop.permute.xlu1 %757 }
 0xa56   :  { %v789_v57 = vpop.permute.xlu1 %788 }
 0xa66   :  { %772 = vperm.xlu0 %1325, %v1157_v29  }
 0xa6a   :  { %793 = vperm.xlu0 %1325, %v1161_v30  }
 0xad9   :  { %v720_v32 = vpop.xlane.xlu0 %719 }
 0xada   :  { %v724_v33 = vmul.f32 0.02173913, %v720_v32 }
 0xadc   :  { %v726_v34 = vadd.f32 1e-05, %v724_v33 }
 0xadd   :  { %v723_v35 = vpop.xlane.xlu0 %722 }
 0xade   :  { %1447 = vrsqrt.f32 %v726_v34  ;;  %v725_v36 = vmul.f32 0.02173913, %v723_v35 }
 0xae0   :  { %v727_v37 = vadd.f32 1e-05, %v725_v36 }
 0xae2   :  { %1449 = vrsqrt.f32 %v727_v37 }
 0xae5   :  { %v773_v48 = vpop.permute.xlu0 %772 }
 0xae8   :  { %v1448_v39 = vpop.eup %1447 }
 0xae9   :  { %v730_v40 = vmul.f32 %v1448_v39, %v714_v22  ;;  %v794_v59 = vpop.permute.xlu0 %793 }
 0xaeb   :  { %v745_v42 = vmul.f32 %v738_v38, %v730_v40 }
 0xaec   :  { %v1450_v43 = vpop.eup %1449 }
 0xaed   :  { %v731_v44 = vmul.f32 %v1450_v43, %v715_v24  ;;  %v760_v45 = vadd.f32 %v753_v41, %v745_v42 }
 0xaef   :  { %v746_v46 = vmul.f32 %v743_v31, %v731_v44  ;;  %v775_v50 = vmul.f32 %v773_v48, %v760_v45  ;;  %vm762_vm15 = vcmp.ge.f32.partialorder %v760_v45, 0.0  ;;  %v1437_v44 = vld [vmem:[%s1800_s1 + $0x18] sm:$0xff]  }
 0xaf1   :  { %v761_v49 = vadd.f32 %v758_v47, %v746_v46  ;;  %v777_v52 = vsel %vm762_vm15, %v760_v45, %v775_v50 }
 0xaf3   :  { %vm763_vm0 = vcmp.ge.f32.partialorder %v761_v49, 0.0  ;;  %v776_v51 = vmul.f32 %v773_v48, %v761_v49 }
 0xaf5   :  { %v778_v53 = vsel %vm763_vm0, %v761_v49, %v776_v51 }
 0xaf6   :  { %v782_v54 = vpack.c.bf16 %v778_v53, %v777_v52 }
 0xaf8   :  { %1249 = vmatpush3.bf16.msra.mxu0 %v782_v54  ;;  %v1170_v54 = vld [vmem:[%s1802_s3 + $0x30] sm:$0xff] }
 0xaf9   :  { %1254 = vmatprep.subr.bf16.mxu0 %v1457_v3 }
 0xafb   :  { %1251 = vmatmul.mubr.msk.bf16.vlgmr.msra.gmra.mrb[8].mxu0 %vm255_vm7, %v1436_v55  ;;  %v1171_v55 = vld [vmem:[%s1802_s3 + $0x38] sm:$0xff] }
 0xafc   :  { %1260 = vmatprep.mubr.msk.bf16.mxu0 %vm1460_vm2, %v1457_v3  ;;  %vm976_vm2 = vcmask 441344  }
 0xbce   :  { %v838_v56 = vpop.f32.mrb[8].mxu0 }
 0xbcf   :  { %v1252_v58 = vpop.f32.mrb[9].mxu0  ;;  %v839_v61 = vadd.f32 %v838_v56, %v789_v57  ;;  %v1172_v56 = vld [vmem:[%s1803_s4 + $0x30] sm:$0xff]  ;;  %v1173_v57 = vld [vmem:[%s1803_s4 + $0x38] sm:$0xff] }
 0xbd0   :  { %v841_v60 = vpop.f32.mrb[10].mxu0  ;;  %v1178_v58 = vld [vmem:[%s1804_s7 + $0x30] sm:$0xff] }
 0xbd1   :  { %v842_v62 = vadd.f32 %v841_v60, %v794_v59  ;;  %v1253_v63 = vpop.f32.mrb[11].mxu0 }
 0xbd3   :  { %v1401_v0 = vpack.i.bf16 %v842_v62, %v839_v61 }
 0xbd5   :  { %1402 = vrot.lane.b32.xlu0 %v1401_v0, %s1465_s19  ;;  %1397 = vrot.lane.b32.xlu1 %v1401_v0, %s1469_s26  ;;  %s1472_s19 = smov 27   ;;  %s1473_s26 = smov 25  }
 0xc47   :  { %v1403_v1 = vpop.permute.xlu0 %1402  ;;  %v1398_v2 = vpop.permute.xlu1 %1397 }
 0xc48   :  { %v1405_v4 = vunpack.i.h.bf16 %v1403_v1  ;;  %v1404_v5 = vunpack.i.l.bf16 %v1403_v1  ;;  %v1400_v6 = vunpack.i.h.bf16 %v1398_v2  ;;  %v1399_v7 = vunpack.i.l.bf16 %v1398_v2 }
 0xc4a   :  { %v854_v8 = vsel %vm308_vm8, 0.0, %v1405_v4  ;;  %v853_v9 = vsel %vm308_vm8, 0.0, %v1404_v5  ;;  %v865_v10 = vsel %vm308_vm8, 0.0, %v1400_v6  ;;  %v864_v11 = vsel %vm308_vm8, 0.0, %v1399_v7  ;;  %v1175_v6 = vld [vmem:[%s1805_s5 + $0x3] ss:$0 sm:$0xff] }
 0xc4b   :  { %v857_v12 = vsel %vm855_vm1, %v854_v8, 0.0  ;;  %v856_v13 = vsel %vm855_vm1, %v853_v9, 0.0  ;;  %v867_v14 = vsel %vm855_vm1, %v865_v10, 0.0  ;;  %v866_v15 = vsel %vm855_vm1, %v864_v11, 0.0  ;;  %v1179_v7 = vld [vmem:[%s1804_s7 + $0x38] sm:$0xff] }
 0xc4c   :  { %v1411_v16 = vpack.i.bf16 %v857_v12, %v856_v13  ;;  %v1406_v17 = vpack.i.bf16 %v867_v14, %v866_v15 }
 0xc4e   :  { %1412 = vrot.lane.b32.xlu0 %v1411_v16, %s1464_s16  ;;  %1407 = vrot.lane.b32.xlu1 %v1406_v17, %s1472_s19 }
 0xc52   :  { %1422 = vrot.lane.b32.xlu0 %v1411_v16, %s1467_s20  ;;  %1417 = vrot.lane.b32.xlu1 %v1406_v17, %s1473_s26 }
 0xc56   :  { %919 = vperm.xlu0 %1325, %v1166_v18   ;;  %1427 = vrot.lane.b32.xlu1 %v1406_v17, %s1470_s10 }
 0xc5a   :  { %924 = vperm.xlu1 %1324, %v1167_v19  }
 0xcc0   :  { %v1413_v20 = vpop.permute.xlu0 %1412  ;;  %v1408_v21 = vpop.permute.xlu1 %1407 }
 0xcc1   :  { %v1410_v22 = vunpack.i.h.bf16 %v1408_v21  ;;  %v1409_v23 = vunpack.i.l.bf16 %v1408_v21  ;;  %v1415_v28 = vunpack.i.h.bf16 %v1413_v20  ;;  %v1414_v29 = vunpack.i.l.bf16 %v1413_v20 }
 0xcc3   :  { %v877_v24 = vsel %vm855_vm1, %v857_v12, %v1410_v22  ;;  %v876_v25 = vsel %vm855_vm1, %v856_v13, %v1409_v23 }
 0xcc4   :  { %v908_v26 = vpack.c.bf16 %v877_v24, %v876_v25  ;;  %v1418_v27 = vpop.permute.xlu1 %1417  ;;  %v1423_v32 = vpop.permute.xlu0 %1422 }
 0xcc5   :  { %v1420_v30 = vunpack.i.h.bf16 %v1418_v27  ;;  %v1419_v31 = vunpack.i.l.bf16 %v1418_v27  ;;  %v1425_v37 = vunpack.i.h.bf16 %v1423_v32  ;;  %v1424_v38 = vunpack.i.l.bf16 %v1423_v32  ;;  %v1438_v32 = vld [vmem:[%s1806_s6 + $0x18] sm:$0xff]  }
 0xcc6   :  { %1255 = vmatpush3.bf16.msra.mxu0 %v908_v26 }
 0xcc7   :  { %v893_v33 = vsel %vm855_vm1, %v1415_v28, %v1420_v30  ;;  %v892_v34 = vsel %vm855_vm1, %v1414_v29, %v1419_v31  ;;  %1256 = vmatprep.subr.bf16.mxu0 %v1457_v3 }
 0xcc8   :  { %v909_v35 = vpack.c.bf16 %v893_v33, %v892_v34  ;;  %v1428_v36 = vpop.permute.xlu1 %1427 }
 0xcc9   :  { %v1430_v39 = vunpack.i.h.bf16 %v1428_v36  ;;  %v1429_v40 = vunpack.i.l.bf16 %v1428_v36 }
 0xcca   :  { %1257 = vmatpush3.bf16.msra.mxu0 %v909_v35 }
 0xccb   :  { %v907_v41 = vsel %vm855_vm1, %v1425_v37, %v1430_v39  ;;  %v906_v42 = vsel %vm855_vm1, %v1424_v38, %v1429_v40  ;;  %1258 = vmatprep.subr.bf16.mxu0 %v1457_v3 }
 0xccc   :  { %v910_v43 = vpack.c.bf16 %v907_v41, %v906_v42 }
 0xcce   :  { %1259 = vmatpush3.bf16.msra.mxu0 %v910_v43 }
 0xcd1   :  { %1261 = vmatmul.mubr.msk.bf16.vlgmr.msra.gmra.mrb[12].mxu0 %vm118_vm3, %v1437_v44 }
 0xcd5   :  { %v920_v45 = vpop.permute.xlu0 %919 }
 0xcd9   :  { %v925_v49 = vpop.permute.xlu1 %924 }
 0xda4   :  { %v969_v46 = vpop.f32.mrb[12].mxu0 }
 0xda5   :  { %v970_v47 = vadd.f32 %v969_v46, %v920_v45  ;;  %v1262_v48 = vpop.f32.mrb[13].mxu0 }
 0xda6   :  { %v972_v50 = vpop.f32.mrb[14].mxu0 }
 0xda7   :  { %v973_v51 = vadd.f32 %v972_v50, %v925_v49  ;;  %v1263_v52 = vpop.f32.mrb[15].mxu0  ;;  %v977_v53 = vsel %vm976_vm2, %v970_v47, 0.0 }
 0xda8   :  { %978 = vadd.xlane.f32.xlu0 %v977_v53 }
 0xda9   :  { %v980_v3 = vsel %vm976_vm2, %v973_v51, 0.0 }
 0xdaa   :  { %981 = vadd.xlane.f32.xlu1 %v980_v3 }
 0xdbb   :  { %1009 = vperm.xlu1 %1324, %v1170_v54  }
 0xdbe   :  { %1014 = vperm.xlu0 %1325, %v1171_v55  }
 0xdbf   :  { %1024 = vperm.xlu1 %1324, %v1172_v56  }
 0xdc3   :  { %1029 = vperm.xlu1 %1324, %v1173_v57  }
 0xdc7   :  { %1060 = vperm.xlu1 %1324, %v1178_v58  }
 0xe35   :  { %v979_v59 = vpop.xlane.xlu0 %978 }
 0xe36   :  { %v984_v60 = vmul.f32 0.018518519, %v979_v59 }
 0xe37   :  { %v982_v61 = vpop.xlane.xlu1 %981 }
 0xe38   :  { %v986_v62 = vsub.f32 %v970_v47, %v984_v60  ;;  %v985_v63 = vmul.f32 0.018518519, %v982_v61 }
 0xe3a   :  { %v987_v0 = vsub.f32 %v973_v51, %v985_v63  ;;  %v988_v1 = vmul.f32 %v986_v62, %v986_v62 }
 0xe3b   :  { %v1010_v15 = vpop.permute.xlu1 %1009 }
 0xe3c   :  { %v990_v2 = vsel %vm976_vm2, %v988_v1, 0.0  ;;  %v989_v4 = vmul.f32 %v987_v0, %v987_v0 }
 0xe3d   :  { %991 = vadd.xlane.f32.xlu0 %v990_v2  ;;  %v1015_v8 = vpop.permute.xlu0 %1014 }
 0xe3e   :  { %v993_v5 = vsel %vm976_vm2, %v989_v4, 0.0 }
 0xe3f   :  { %v1025_v18 = vpop.permute.xlu1 %1024 }
 0xe41   :  { %994 = vadd.xlane.f32.xlu0 %v993_v5 }
 0xe43   :  { %v1030_v24 = vpop.permute.xlu1 %1029 }
 0xe47   :  { %v1061_v33 = vpop.permute.xlu1 %1060 }
 0xe57   :  { %1044 = vperm.xlu0 %1325, %v1175_v6  }
 0xe5b   :  { %1065 = vperm.xlu0 %1325, %v1179_v7  }
 0xeca   :  { %v992_v9 = vpop.xlane.xlu0 %991 }
 0xecb   :  { %v996_v10 = vmul.f32 0.018518519, %v992_v9 }
 0xecd   :  { %v998_v11 = vadd.f32 1e-05, %v996_v10 }
 0xece   :  { %v995_v12 = vpop.xlane.xlu0 %994 }
 0xecf   :  { %1451 = vrsqrt.f32 %v998_v11  ;;  %v997_v13 = vmul.f32 0.018518519, %v995_v12 }
 0xed1   :  { %v999_v14 = vadd.f32 1e-05, %v997_v13 }
 0xed3   :  { %1453 = vrsqrt.f32 %v999_v14 }
 0xed6   :  { %v1045_v25 = vpop.permute.xlu0 %1044 }
 0xed9   :  { %v1452_v16 = vpop.eup %1451 }
 0xeda   :  { %v1002_v17 = vmul.f32 %v1452_v16, %v986_v62  ;;  %v1066_v37 = vpop.permute.xlu0 %1065 }
 0xedc   :  { %v1017_v19 = vmul.f32 %v1010_v15, %v1002_v17 }
 0xedd   :  { %v1454_v20 = vpop.eup %1453 }
 0xede   :  { %v1003_v21 = vmul.f32 %v1454_v20, %v987_v0  ;;  %v1032_v22 = vadd.f32 %v1025_v18, %v1017_v19 }
 0xee0   :  { %v1018_v23 = vmul.f32 %v1015_v8, %v1003_v21  ;;  %v1047_v27 = vmul.f32 %v1045_v25, %v1032_v22  ;;  %vm1034_vm3 = vcmp.ge.f32.partialorder %v1032_v22, 0.0 }
 0xee2   :  { %v1033_v26 = vadd.f32 %v1030_v24, %v1018_v23  ;;  %v1049_v29 = vsel %vm1034_vm3, %v1032_v22, %v1047_v27 }
 0xee4   :  { %vm1035_vm4 = vcmp.ge.f32.partialorder %v1033_v26, 0.0  ;;  %v1048_v28 = vmul.f32 %v1045_v25, %v1033_v26 }
 0xee6   :  { %v1050_v30 = vsel %vm1035_vm4, %v1033_v26, %v1048_v28 }
 0xee7   :  { %v1054_v31 = vpack.c.bf16 %v1050_v30, %v1049_v29 }
 0xee9   :  { %1265 = vmatpush3.bf16.msra.mxu1 %v1054_v31 }
 0xeec   :  { %1267 = vmatmul.mubr.msk.bf16.vlgmr.msra.gmra.mrb[12].mxu1 %vm255_vm7, %v1438_v32 }
 0xfbf   :  { %v1110_v34 = vpop.f32.mrb[12].mxu1 }
 0xfc0   :  { %v1111_v35 = vadd.f32 %v1110_v34, %v1061_v33  ;;  %v1268_v36 = vpop.f32.mrb[13].mxu1 }
 0xfc1   :  { %v1113_v38 = vpop.f32.mrb[14].mxu1 }
 0xfc2   :  { %1117 = vst.msk [vmem:[%s1807_s8] sm:$0xff] %vm976_vm2, %v1111_v35  ;;  %v1114_v39 = vadd.f32 %v1113_v38, %v1066_v37  ;;  %v1269_v40 = vpop.f32.mrb[15].mxu1 }
 0xfc4   :  { %1118 = vst.msk [vmem:[%s1807_s8 + $0x8] sm:$0xff] %vm976_vm2, %v1114_v39 }

</bundles_post_ra>
